<compile_context>
chip_gen: v7x
topology: tpu7x:2x2x1
jax: 0.10.0
libtpu: 0.0.40
codegen_flags: <defaults>
</compile_context>

<pallas_src>
import functools
import math

import jax
import jax.numpy as jnp
from jax.experimental import pallas as pl
from jax.experimental.pallas import tpu as pltpu


# ----------------------------------------------------------------------------
# Fused MaxPool(2) + DoubleConv (conv3x3+BN+ReLU twice) kernel
# ----------------------------------------------------------------------------
def _down_fused_kernel(x_ref, w1_ref, w2_ref, b1_ref, b2_ref, o_ref, *, pack_lanes):
    # x_ref:  (1, H, Wo, 2*Cin)  NHWC input with each 2-wide pooling group packed
    #                            contiguously on the lane axis
    # w1_ref: (9*Cin,  Cmid)     im2col-ordered weights (dy, dx, cin), BN1 folded
    # w2_ref: (9*Cmid, Cout)     im2col-ordered weights (dy, dx, cmid), BN2 folded
    # b1_ref: (1, Cmid) f32      folded BN1 bias
    # b2_ref: (1, Cout) f32      folded BN2 bias
    # o_ref:  (1, Ho, Wo*Cout) or (1, Ho, Wo, Cout) depending on pack_lanes
    H = x_ref.shape[1]
    Wo = x_ref.shape[2]
    Cin = x_ref.shape[3] // 2
    Ho = H // 2
    Wp = Wo + 2                      # padded row width: zero col 0, data 1..Wo, zero col Wo+1
    M = Ho * Wp                      # matmul M (2 discarded pad columns per image row)
    Cmid = w1_ref.shape[1]
    Cout = w2_ref.shape[1]
    dt = x_ref.dtype

    # ---- MaxPool2d(2): lane-half max (horizontal) then even/odd-row max --------
    x = x_ref[0]                                         # (H, Wo, 2*Cin)
    hmax = jnp.maximum(x[:, :, :Cin], x[:, :, Cin:])     # (H, Wo, Cin)
    hr = hmax.reshape(Ho, 2, Wo, Cin)
    pooled = jnp.maximum(hr[:, 0], hr[:, 1])             # (Ho, Wo, Cin)

    # Column-validity mask for the width-Wp row layout (valid columns 1..Wo).
    col = jax.lax.broadcasted_iota(jnp.int32, (Ho, Wp, 1), 1).reshape(M, 1)
    col_valid = jnp.logical_and(col >= 1, col <= Wo)

    def conv3x3(data2, w_r, b_r):
        # data2: (M, C) = row-major (Ho, Wp, C) with zero pad columns at 0 and Wo+1.
        # Returns (M, N) f32 pre-activation (bias added, not yet ReLU'd).
        #
        # Flat-shift conv: with two zero rows above/below, the input needed by
        # output m (= h*Wp + w + 1) for tap (dy, dx) sits at flat row
        # m + (dy+1)*Wp + (dx-1), so each tap's LHS is a contiguous slice.
        C = data2.shape[-1]
        zr = jnp.zeros((2 * Wp, C), data2.dtype)
        flat = jnp.concatenate([zr, data2, zr], axis=0)          # ((Ho+4)*Wp, C)
        acc = jnp.zeros((M, w_r.shape[1]), jnp.float32)
        if C < 128:
            # Group the 3 dx taps on the lane axis -> K = 3*C (keeps the MXU fed).
            le = (Ho + 4) * Wp - 2
            e = jnp.concatenate(
                [flat[0:le], flat[1:le + 1], flat[2:le + 2]], axis=-1)   # (le, 3C)
            for dy in range(3):
                s = (dy + 1) * Wp - 1
                acc = acc + jnp.dot(e[s:s + M, :],
                                    w_r[dy * 3 * C:(dy + 1) * 3 * C, :],
                                    preferred_element_type=jnp.float32)
        else:
            # 9 tap-accumulated matmuls, K = C (no extra buffers at all).
            for dy in range(3):
                for dx in range(3):
                    s = (dy + 1) * Wp + dx - 1
                    t = dy * 3 + dx
                    acc = acc + jnp.dot(flat[s:s + M, :],
                                        w_r[t * C:(t + 1) * C, :],
                                        preferred_element_type=jnp.float32)
        return acc + b_r[...]

    # Place pooled data at columns 1..Wo of width-Wp rows (pad columns are zero).
    zc = jnp.zeros((Ho, 1, Cin), dt)
    act1 = jnp.concatenate([zc, pooled, zc], axis=1).reshape(M, Cin)

    # ---- conv1 + BN + ReLU (pad columns re-zeroed by the mask, fused w/ ReLU) --
    a1 = conv3x3(act1, w1_ref, b1_ref)                           # (M, Cmid) f32
    y1 = jnp.where(col_valid, jnp.maximum(a1, 0.0), 0.0).astype(dt)

    # ---- conv2 + BN + ReLU -----------------------------------------------------
    a2 = conv3x3(y1, w2_ref, b2_ref)                             # (M, Cout) f32
    y2 = jnp.maximum(a2, 0.0).reshape(Ho, Wp, Cout)[:, 1:Wo + 1, :]   # (Ho, Wo, Cout)

    if pack_lanes:
        o_ref[0] = y2.reshape(Ho, Wo * Cout).astype(o_ref.dtype)
    else:
        o_ref[0] = y2.astype(o_ref.dtype)


def down_forward(x_nchw, params, compute_dtype=jnp.float32):
    """MaxPool(2) + DoubleConv, fused in one pallas_call.  Input/output NCHW."""
    B, Cin, H, W = x_nchw.shape
    assert H % 2 == 0 and W % 2 == 0, "MaxPool2d(2) fusion requires even H, W"
    Ho, Wo = H // 2, W // 2
    Wp = Wo + 2
    w1, w2 = params["w1"], params["w2"]
    Cmid, Cout = w1.shape[-1], w2.shape[-1]

    # NCHW -> NHWC once at the module boundary; the reshape is a free contiguous
    # view putting each 2-wide pooling group on the lane axis.
    x = jnp.transpose(x_nchw, (0, 2, 3, 1)).astype(compute_dtype)
    x = x.reshape(B, H, Wo, 2 * Cin)

    # Fold BN scale into the im2col-ordered conv weights (conv(w*s) == conv(w)*s).
    w1_f = (w1.reshape(9 * Cin, Cmid) * params["scale1"][None, :]).astype(compute_dtype)
    w2_f = (w2.reshape(9 * Cmid, Cout) * params["scale2"][None, :]).astype(compute_dtype)
    b1 = params["bias1"].reshape(1, Cmid).astype(jnp.float32)
    b2 = params["bias2"].reshape(1, Cout).astype(jnp.float32)

    # Lane-dense output: channels-last when Cout is already a full lane multiple,
    # otherwise pack W into the lane axis (avoids narrow masked partial stores).
    pack_lanes = (Cout % 128) != 0
    if pack_lanes:
        out_shape = jax.ShapeDtypeStruct((B, Ho, Wo * Cout), compute_dtype)
        out_spec = pl.BlockSpec((1, Ho, Wo * Cout), lambda b: (b, 0, 0))
    else:
        out_shape = jax.ShapeDtypeStruct((B, Ho, Wo, Cout), compute_dtype)
        out_spec = pl.BlockSpec((1, Ho, Wo, Cout), lambda b: (b, 0, 0, 0))

    itm = jnp.dtype(compute_dtype).itemsize
    flops = 2 * B * Ho * Wp * 9 * (Cin * Cmid + Cmid * Cout)
    bytes_accessed = (itm * (B * H * Wo * 2 * Cin + 9 * Cin * Cmid + 9 * Cmid * Cout
                             + B * Ho * Wo * Cout) + 4 * (Cmid + Cout))

    # Rough per-step VMEM demand: input/output blocks are double-buffered by the
    # pipeline, padded activations / grouped-dx buffer / f32 accumulators live once.
    est = (itm * (2 * H * Wo * 2 * Cin + 2 * Ho * Wo * Cout
                  + 9 * Cin * Cmid + 9 * Cmid * Cout)
           + 4 * Ho * Wp * (4 * max(Cin, Cmid) + Cmid + Cout))
    vmem_limit = int(min(max(4 * est, 32 * 1024 * 1024), 100 * 1024 * 1024))

    kernel = functools.partial(_down_fused_kernel, pack_lanes=pack_lanes)

    out = pl.pallas_call(
        kernel,
        out_shape=out_shape,
        grid=(B,),
        in_specs=[
            pl.BlockSpec((1, H, Wo, 2 * Cin), lambda b: (b, 0, 0, 0)),
            pl.BlockSpec((9 * Cin, Cmid), lambda b: (0, 0)),
            pl.BlockSpec((9 * Cmid, Cout), lambda b: (0, 0)),
            pl.BlockSpec((1, Cmid), lambda b: (0, 0)),
            pl.BlockSpec((1, Cout), lambda b: (0, 0)),
        ],
        out_specs=out_spec,
        compiler_params=pltpu.CompilerParams(
            dimension_semantics=("parallel",),       # shard batch across TCs
            vmem_limit_bytes=vmem_limit,
        ),
        cost_estimate=pl.CostEstimate(
            flops=int(flops), transcendentals=0, bytes_accessed=int(bytes_accessed)),
    )(x, w1_f, w2_f, b1, b2)

    out = out.reshape(B, Ho, Wo, Cout)               # free view
    return jnp.transpose(out, (0, 3, 1, 2)).astype(x_nchw.dtype)   # NHWC -> NCHW


# ----------------------------------------------------------------------------
# Parameter init (inference-mode BatchNorm folded into scale/bias)
# ----------------------------------------------------------------------------
_BN_EPS = 1e-5


def _fold_bn(gamma, beta, mean, var):
    scale = gamma / jnp.sqrt(var + _BN_EPS)
    bias = beta - mean * scale
    return scale, bias


def init_down_params(key, in_channels, out_channels):
    mid = out_channels  # DoubleConv with mid_channels=None -> mid = out_channels
    k = jax.random.split(key, 10)

    def conv_w(kk, cin, cout):
        std = 1.0 / math.sqrt(cin * 9)
        return jax.random.normal(kk, (3, 3, cin, cout), jnp.float32) * std  # HWIO

    w1 = conv_w(k[0], in_channels, mid)
    w2 = conv_w(k[1], mid, out_channels)

    g1 = 1.0 + 0.1 * jax.random.normal(k[2], (mid,), jnp.float32)
    b1 = 0.1 * jax.random.normal(k[3], (mid,), jnp.float32)
    m1 = 0.05 * jax.random.normal(k[4], (mid,), jnp.float32)
    v1 = 1.0 + 0.1 * jnp.abs(jax.random.normal(k[5], (mid,), jnp.float32))

    g2 = 1.0 + 0.1 * jax.random.normal(k[6], (out_channels,), jnp.float32)
    b2 = 0.1 * jax.random.normal(k[7], (out_channels,), jnp.float32)
    m2 = 0.05 * jax.random.normal(k[8], (out_channels,), jnp.float32)
    v2 = 1.0 + 0.1 * jnp.abs(jax.random.normal(k[9], (out_channels,), jnp.float32))

    s1, bb1 = _fold_bn(g1, b1, m1, v1)
    s2, bb2 = _fold_bn(g2, b2, m2, v2)
    return {"w1": w1, "scale1": s1, "bias1": bb1,
            "w2": w2, "scale2": s2, "bias2": bb2}


# Plain-JAX reference (correctness check only).
def down_reference(x_nchw, params):
    x = jnp.transpose(x_nchw, (0, 2, 3, 1))
    x = jax.lax.reduce_window(x, -jnp.inf, jax.lax.max,
                              (1, 2, 2, 1), (1, 2, 2, 1), "VALID")

    def cbr(x, w, scale, bias):
        y = jax.lax.conv_general_dilated(
            x, w, window_strides=(1, 1), padding="SAME",
            dimension_numbers=("NHWC", "HWIO", "NHWC"))
        y = y * scale + bias
        return jnp.maximum(y, 0.0)

    x = cbr(x, params["w1"], params["scale1"], params["bias1"])
    x = cbr(x, params["w2"], params["scale2"], params["bias2"])
    return jnp.transpose(x, (0, 3, 1, 2))


if __name__ == "__main__":
    # TODO(synk): training-mode BatchNorm (batch statistics) not implemented;
    #             this is the standard inference-mode (running stats) forward.
    key = jax.random.PRNGKey(0)
    kx, kp, kx2, kp2 = jax.random.split(key, 4)

    # Case 1: small channels (grouped-dx K=3C matmul path, lane-packed output).
    B, C_IN, C_OUT, H, W = 2, 4, 8, 16, 16
    x = jax.random.normal(kx, (B, C_IN, H, W), jnp.float32)   # NCHW like PyTorch
    params = init_down_params(kp, C_IN, C_OUT)
    ref = jax.block_until_ready(down_reference(x, params))

    out = jax.block_until_ready(down_forward(x, params))
    assert out.shape == (B, C_OUT, H // 2, W // 2), out.shape
    assert jnp.allclose(out, ref, atol=1e-4, rtol=1e-4), \
        float(jnp.max(jnp.abs(out - ref)))

    # bf16 activations/weights (f32 accumulate + epilogue): loose tolerance.
    out_bf16 = jax.block_until_ready(
        down_forward(x, params, compute_dtype=jnp.bfloat16))
    assert jnp.allclose(out_bf16, ref, atol=0.15, rtol=0.15), \
        float(jnp.max(jnp.abs(out_bf16 - ref)))

    # Case 2: 128 channels (per-tap K=C path, channels-last lane-dense output).
    B2, C2, H2 = 1, 128, 8
    x2 = jax.random.normal(kx2, (B2, C2, H2, H2), jnp.float32)
    params2 = init_down_params(kp2, C2, C2)
    ref2 = jax.block_until_ready(down_reference(x2, params2))
    out2 = jax.block_until_ready(down_forward(x2, params2))
    assert out2.shape == (B2, C2, H2 // 2, H2 // 2), out2.shape
    assert jnp.allclose(out2, ref2, atol=2e-3, rtol=2e-3), \
        float(jnp.max(jnp.abs(out2 - ref2)))

    print("KERNEL_OK")
</pallas_src>

<mosaic_0001>
module attributes {stable_mosaic.version = 11 : i64} {
  func.func @_down_fused_kernel(%arg0: i32, %arg1: memref<1x16x8x8xf32, #tpu.memory_space<vmem>>, %arg2: memref<36x8xf32, #tpu.memory_space<vmem>>, %arg3: memref<72x8xf32, #tpu.memory_space<vmem>>, %arg4: memref<1x8xf32, #tpu.memory_space<vmem>>, %arg5: memref<1x8xf32, #tpu.memory_space<vmem>>, %arg6: memref<1x8x64xf32, #tpu.memory_space<vmem>>) attributes {dimension_semantics = [#tpu.dimension_semantics<parallel>], iteration_bounds = array<i64: 2>, scalar_prefetch = 0 : i64, scratch_operands = 0 : i64, tpu.core_type = #tpu.core_type<tc>, window_params = [{transform_indices = @transform_0, window_bounds = array<i64: 1, 16, 8, 8>}, {pipeline_mode = #tpu.pipeline_mode<synchronous>, transform_indices = @transform_1, window_bounds = array<i64: 36, 8>}, {pipeline_mode = #tpu.pipeline_mode<synchronous>, transform_indices = @transform_2, window_bounds = array<i64: 72, 8>}, {pipeline_mode = #tpu.pipeline_mode<synchronous>, transform_indices = @transform_3, window_bounds = array<i64: 1, 8>}, {pipeline_mode = #tpu.pipeline_mode<synchronous>, transform_indices = @transform_4, window_bounds = array<i64: 1, 8>}, {transform_indices = @transform_5, window_bounds = array<i64: 1, 8, 64>}]} {
    %c0 = arith.constant 0 : index
    %c0_0 = arith.constant 0 : index
    %c0_1 = arith.constant 0 : index
    %c0_2 = arith.constant 0 : index
    %0 = vector.load %arg1[%c0, %c0_0, %c0_1, %c0_2] : memref<1x16x8x8xf32, #tpu.memory_space<vmem>>, vector<1x16x8x8xf32>
    %1 = vector.shape_cast %0 : vector<1x16x8x8xf32> to vector<16x8x8xf32>
    %2 = vector.extract_strided_slice %1 {offsets = [0, 0, 0], sizes = [16, 8, 4], strides = [1, 1, 1]} : vector<16x8x8xf32> to vector<16x8x4xf32>
    %3 = vector.extract_strided_slice %1 {offsets = [0, 0, 4], sizes = [16, 8, 4], strides = [1, 1, 1]} : vector<16x8x8xf32> to vector<16x8x4xf32>
    %4 = arith.maximumf %2, %3 : vector<16x8x4xf32>
    %5 = vector.shape_cast %4 : vector<16x8x4xf32> to vector<8x2x8x4xf32>
    %6 = vector.extract_strided_slice %5 {offsets = [0, 0, 0, 0], sizes = [8, 1, 8, 4], strides = [1, 1, 1, 1]} : vector<8x2x8x4xf32> to vector<8x1x8x4xf32>
    %7 = vector.shape_cast %6 : vector<8x1x8x4xf32> to vector<8x8x4xf32>
    %8 = vector.extract_strided_slice %5 {offsets = [0, 1, 0, 0], sizes = [8, 1, 8, 4], strides = [1, 1, 1, 1]} : vector<8x2x8x4xf32> to vector<8x1x8x4xf32>
    %9 = vector.shape_cast %8 : vector<8x1x8x4xf32> to vector<8x8x4xf32>
    %10 = arith.maximumf %7, %9 : vector<8x8x4xf32>
    %11 = tpu.iota {dimensions = array<i32: 1>} : vector<8x10x1xi32>
    %12 = vector.shape_cast %11 : vector<8x10x1xi32> to vector<80x1xi32>
    %c1_i32 = arith.constant 1 : i32
    %13 = vector.broadcast %c1_i32 : i32 to vector<80x1xi32>
    %14 = arith.cmpi sge, %12, %13 : vector<80x1xi32>
    %c8_i32 = arith.constant 8 : i32
    %15 = vector.broadcast %c8_i32 : i32 to vector<80x1xi32>
    %16 = arith.cmpi sle, %12, %15 : vector<80x1xi32>
    %17 = arith.andi %14, %16 : vector<80x1xi1>
    %cst = arith.constant 0.000000e+00 : f32
    %18 = vector.broadcast %cst : f32 to vector<8x1x4xf32>
    %19 = tpu.concatenate %18, %10, %18 in 1 : vector<8x1x4xf32>, vector<8x8x4xf32>, vector<8x1x4xf32> -> vector<8x10x4xf32>
    %20 = vector.shape_cast %19 : vector<8x10x4xf32> to vector<80x4xf32>
    %cst_3 = arith.constant 0.000000e+00 : f32
    %21 = vector.broadcast %cst_3 : f32 to vector<20x4xf32>
    %22 = tpu.concatenate %21, %20, %21 in 0 : vector<20x4xf32>, vector<80x4xf32>, vector<20x4xf32> -> vector<120x4xf32>
    %cst_4 = arith.constant 0.000000e+00 : f32
    %23 = vector.broadcast %cst_4 : f32 to vector<80x8xf32>
    %24 = vector.extract_strided_slice %22 {offsets = [0, 0], sizes = [118, 4], strides = [1, 1]} : vector<120x4xf32> to vector<118x4xf32>
    %25 = vector.extract_strided_slice %22 {offsets = [1, 0], sizes = [118, 4], strides = [1, 1]} : vector<120x4xf32> to vector<118x4xf32>
    %26 = vector.extract_strided_slice %22 {offsets = [2, 0], sizes = [118, 4], strides = [1, 1]} : vector<120x4xf32> to vector<118x4xf32>
    %27 = tpu.concatenate %24, %25, %26 in 1 : vector<118x4xf32>, vector<118x4xf32>, vector<118x4xf32> -> vector<118x12xf32>
    %28 = vector.extract_strided_slice %27 {offsets = [9, 0], sizes = [80, 12], strides = [1, 1]} : vector<118x12xf32> to vector<80x12xf32>
    %c0_5 = arith.constant 0 : index
    %c0_6 = arith.constant 0 : index
    %29 = vector.load %arg2[%c0_5, %c0_6] : memref<36x8xf32, #tpu.memory_space<vmem>>, vector<12x8xf32>
    %cst_7 = arith.constant dense<0.000000e+00> : vector<80x8xf32>
    %30 = tpu.matmul %28, %29, %cst_7 {dimension_numbers = #tpu.dot_dimension_numbers<[1], [0], [0], [1], [0, 0, 1, 1], [], []>} : vector<80x12xf32>, vector<12x8xf32>, vector<80x8xf32> -> vector<80x8xf32>
    %31 = arith.addf %23, %30 : vector<80x8xf32>
    %32 = vector.extract_strided_slice %27 {offsets = [19, 0], sizes = [80, 12], strides = [1, 1]} : vector<118x12xf32> to vector<80x12xf32>
    %c12 = arith.constant 12 : index
    %c0_8 = arith.constant 0 : index
    %33 = vector.load %arg2[%c12, %c0_8] : memref<36x8xf32, #tpu.memory_space<vmem>>, vector<12x8xf32>
    %cst_9 = arith.constant dense<0.000000e+00> : vector<80x8xf32>
    %34 = tpu.matmul %32, %33, %cst_9 {dimension_numbers = #tpu.dot_dimension_numbers<[1], [0], [0], [1], [0, 0, 1, 1], [], []>} : vector<80x12xf32>, vector<12x8xf32>, vector<80x8xf32> -> vector<80x8xf32>
    %35 = arith.addf %31, %34 : vector<80x8xf32>
    %36 = vector.extract_strided_slice %27 {offsets = [29, 0], sizes = [80, 12], strides = [1, 1]} : vector<118x12xf32> to vector<80x12xf32>
    %c24 = arith.constant 24 : index
    %c0_10 = arith.constant 0 : index
    %37 = vector.load %arg2[%c24, %c0_10] : memref<36x8xf32, #tpu.memory_space<vmem>>, vector<12x8xf32>
    %cst_11 = arith.constant dense<0.000000e+00> : vector<80x8xf32>
    %38 = tpu.matmul %36, %37, %cst_11 {dimension_numbers = #tpu.dot_dimension_numbers<[1], [0], [0], [1], [0, 0, 1, 1], [], []>} : vector<80x12xf32>, vector<12x8xf32>, vector<80x8xf32> -> vector<80x8xf32>
    %39 = arith.addf %35, %38 : vector<80x8xf32>
    %c0_12 = arith.constant 0 : index
    %c0_13 = arith.constant 0 : index
    %40 = vector.load %arg4[%c0_12, %c0_13] : memref<1x8xf32, #tpu.memory_space<vmem>>, vector<1x8xf32>
    %41 = vector.broadcast %40 : vector<1x8xf32> to vector<80x8xf32>
    %42 = arith.addf %39, %41 : vector<80x8xf32>
    %cst_14 = arith.constant 0.000000e+00 : f32
    %43 = vector.broadcast %cst_14 : f32 to vector<80x8xf32>
    %44 = arith.maximumf %42, %43 : vector<80x8xf32>
    %cst_15 = arith.constant 0.000000e+00 : f32
    %45 = vector.shape_cast %17 : vector<80x1xi1> to vector<80x1xi1>
    %46 = vector.broadcast %45 : vector<80x1xi1> to vector<80x8xi1>
    %47 = vector.broadcast %cst_15 : f32 to vector<80x8xf32>
    %48 = arith.select %46, %44, %47 : vector<80x8xi1>, vector<80x8xf32>
    %cst_16 = arith.constant 0.000000e+00 : f32
    %49 = vector.broadcast %cst_16 : f32 to vector<20x8xf32>
    %50 = tpu.concatenate %49, %48, %49 in 0 : vector<20x8xf32>, vector<80x8xf32>, vector<20x8xf32> -> vector<120x8xf32>
    %cst_17 = arith.constant 0.000000e+00 : f32
    %51 = vector.broadcast %cst_17 : f32 to vector<80x8xf32>
    %52 = vector.extract_strided_slice %50 {offsets = [0, 0], sizes = [118, 8], strides = [1, 1]} : vector<120x8xf32> to vector<118x8xf32>
    %53 = vector.extract_strided_slice %50 {offsets = [1, 0], sizes = [118, 8], strides = [1, 1]} : vector<120x8xf32> to vector<118x8xf32>
    %54 = vector.extract_strided_slice %50 {offsets = [2, 0], sizes = [118, 8], strides = [1, 1]} : vector<120x8xf32> to vector<118x8xf32>
    %55 = tpu.concatenate %52, %53, %54 in 1 : vector<118x8xf32>, vector<118x8xf32>, vector<118x8xf32> -> vector<118x24xf32>
    %56 = vector.extract_strided_slice %55 {offsets = [9, 0], sizes = [80, 24], strides = [1, 1]} : vector<118x24xf32> to vector<80x24xf32>
    %c0_18 = arith.constant 0 : index
    %c0_19 = arith.constant 0 : index
    %57 = vector.load %arg3[%c0_18, %c0_19] : memref<72x8xf32, #tpu.memory_space<vmem>>, vector<24x8xf32>
    %cst_20 = arith.constant dense<0.000000e+00> : vector<80x8xf32>
    %58 = tpu.matmul %56, %57, %cst_20 {dimension_numbers = #tpu.dot_dimension_numbers<[1], [0], [0], [1], [0, 0, 1, 1], [], []>} : vector<80x24xf32>, vector<24x8xf32>, vector<80x8xf32> -> vector<80x8xf32>
    %59 = arith.addf %51, %58 : vector<80x8xf32>
    %60 = vector.extract_strided_slice %55 {offsets = [19, 0], sizes = [80, 24], strides = [1, 1]} : vector<118x24xf32> to vector<80x24xf32>
    %c24_21 = arith.constant 24 : index
    %c0_22 = arith.constant 0 : index
    %61 = vector.load %arg3[%c24_21, %c0_22] : memref<72x8xf32, #tpu.memory_space<vmem>>, vector<24x8xf32>
    %cst_23 = arith.constant dense<0.000000e+00> : vector<80x8xf32>
    %62 = tpu.matmul %60, %61, %cst_23 {dimension_numbers = #tpu.dot_dimension_numbers<[1], [0], [0], [1], [0, 0, 1, 1], [], []>} : vector<80x24xf32>, vector<24x8xf32>, vector<80x8xf32> -> vector<80x8xf32>
    %63 = arith.addf %59, %62 : vector<80x8xf32>
    %64 = vector.extract_strided_slice %55 {offsets = [29, 0], sizes = [80, 24], strides = [1, 1]} : vector<118x24xf32> to vector<80x24xf32>
    %c48 = arith.constant 48 : index
    %c0_24 = arith.constant 0 : index
    %65 = vector.load %arg3[%c48, %c0_24] : memref<72x8xf32, #tpu.memory_space<vmem>>, vector<24x8xf32>
    %cst_25 = arith.constant dense<0.000000e+00> : vector<80x8xf32>
    %66 = tpu.matmul %64, %65, %cst_25 {dimension_numbers = #tpu.dot_dimension_numbers<[1], [0], [0], [1], [0, 0, 1, 1], [], []>} : vector<80x24xf32>, vector<24x8xf32>, vector<80x8xf32> -> vector<80x8xf32>
    %67 = arith.addf %63, %66 : vector<80x8xf32>
    %c0_26 = arith.constant 0 : index
    %c0_27 = arith.constant 0 : index
    %68 = vector.load %arg5[%c0_26, %c0_27] : memref<1x8xf32, #tpu.memory_space<vmem>>, vector<1x8xf32>
    %69 = vector.broadcast %68 : vector<1x8xf32> to vector<80x8xf32>
    %70 = arith.addf %67, %69 : vector<80x8xf32>
    %cst_28 = arith.constant 0.000000e+00 : f32
    %71 = vector.broadcast %cst_28 : f32 to vector<80x8xf32>
    %72 = arith.maximumf %70, %71 : vector<80x8xf32>
    %73 = vector.shape_cast %72 : vector<80x8xf32> to vector<8x10x8xf32>
    %74 = vector.extract_strided_slice %73 {offsets = [0, 1, 0], sizes = [8, 8, 8], strides = [1, 1, 1]} : vector<8x10x8xf32> to vector<8x8x8xf32>
    %75 = vector.shape_cast %74 : vector<8x8x8xf32> to vector<8x64xf32>
    %c0_29 = arith.constant 0 : index
    %c0_30 = arith.constant 0 : index
    %c0_31 = arith.constant 0 : index
    %76 = vector.load %arg6[%c0_29, %c0_30, %c0_31] : memref<1x8x64xf32, #tpu.memory_space<vmem>>, vector<1x8x64xf32>
    %77 = vector.shape_cast %76 : vector<1x8x64xf32> to vector<8x64xf32>
    %78 = vector.shape_cast %75 : vector<8x64xf32> to vector<1x8x64xf32>
    tpu.vector_store %arg6[%c0_29, %c0_30, %c0_31], %78 {strides = array<i32>} : memref<1x8x64xf32, #tpu.memory_space<vmem>>, vector<1x8x64xf32>,
    return
  }
  func.func @transform_0(%arg0: i32) -> (i32, i32, i32, i32) {
    %c0_i32 = arith.constant 0 : i32
    %c0_i32_0 = arith.constant 0 : i32
    %c0_i32_1 = arith.constant 0 : i32
    %c0_i32_2 = arith.constant 0 : i32
    return %arg0, %c0_i32, %c0_i32_0, %c0_i32_1 : i32, i32, i32, i32
  }
  func.func @transform_1(%arg0: i32) -> (i32, i32) {
    %c0_i32 = arith.constant 0 : i32
    %c0_i32_0 = arith.constant 0 : i32
    %c0_i32_1 = arith.constant 0 : i32
    return %c0_i32, %c0_i32_0 : i32, i32
  }
  func.func @transform_2(%arg0: i32) -> (i32, i32) {
    %c0_i32 = arith.constant 0 : i32
    %c0_i32_0 = arith.constant 0 : i32
    %c0_i32_1 = arith.constant 0 : i32
    return %c0_i32, %c0_i32_0 : i32, i32
  }
  func.func @transform_3(%arg0: i32) -> (i32, i32) {
    %c0_i32 = arith.constant 0 : i32
    %c0_i32_0 = arith.constant 0 : i32
    %c0_i32_1 = arith.constant 0 : i32
    return %c0_i32, %c0_i32_0 : i32, i32
  }
  func.func @transform_4(%arg0: i32) -> (i32, i32) {
    %c0_i32 = arith.constant 0 : i32
    %c0_i32_0 = arith.constant 0 : i32
    %c0_i32_1 = arith.constant 0 : i32
    return %c0_i32, %c0_i32_0 : i32, i32
  }
  func.func @transform_5(%arg0: i32) -> (i32, i32, i32) {
    %c0_i32 = arith.constant 0 : i32
    %c0_i32_0 = arith.constant 0 : i32
    %c0_i32_1 = arith.constant 0 : i32
    return %arg0, %c0_i32, %c0_i32_0 : i32, i32, i32
  }
}

</mosaic_0001>

<bundles_post_ra>
// kernel: tpu_custom_call.1
= control target key start
LH: loop header
LB: loop body
LE: loop exit
PB: predicated region body
PF: predicated region fallthrough
CT: control target
= control target key end

     0   :  { %10 = vsyncpa [#allocation3], 0  ;;  %s5239_s0 = inlined_call_operand.vmem [shape: f32[2,16,8,8], index: 0, kind: input, shape index: {}]   ;;  %s5240_s1 = inlined_call_operand.vmem [shape: f32[36,8], index: 1, kind: input, shape index: {}]   ;;  %s5241_s2 = inlined_call_operand.vmem [shape: f32[72,8], index: 2, kind: input, shape index: {}]   ;;  %s5242_s3 = inlined_call_operand.vmem [shape: f32[1,8], index: 3, kind: input, shape index: {}]   ;;  %s5243_s4 = inlined_call_operand.vmem [shape: f32[1,8], index: 4, kind: input, shape index: {}]   ;;  %s5244_s5 = inlined_call_operand.hbm [shape: f32[2,8,64], index: 5, kind: output, shape index: {}]  }
   0x1   :  { %12 = vsyncpa [#allocation3 + $0x1], 0  ;;  %s3952_s18 = smov 0   ;;  %s3954_s19 = smov 0  }
   0x2   :  { %s3956_s20 = smov 0   ;;  %s3958_s21 = smov 0  }
   0x3 LB: > { %s3973_s22 = sadd.s32 4294967295, %s3902_s21   ;;  %s3426_s23 = sadd.s32 4294967294, %s3902_s21   ;;  %s3902_s21 = sphi %s3958_s21, %s5266_s21   ;;  %s3898_s20 = sphi %s3956_s20, %s5265_s20   ;;  %s3894_s19 = sphi %s3954_s19, %s5264_s19   ;;  %s3890_s18 = sphi %s3952_s18, %s5263_s18  }
   0x4   : > { %s3977_s24 = sadd.s32 1, %s3902_s21   ;;  %s135_s25 = sadd.s32 1, %s3898_s20 }
   0x5   : > { %s132_s26 = ssub.s32 %s3902_s21, %s3977_s24  ;;  %p145_p0 = scmp.ne.s32.totalorder %s3898_s20, %s3894_s19 }
   0x6   : > { %p133_p1 = scmp.eq.s32.totalorder %s132_s26, 0  ;;  %p146_p2 = scmp.eq.s32.totalorder %s3973_s22, 1 }
   0x7   : > { %p151_p3 = scmp.ne.s32.totalorder %s3894_s19, %s3890_s18  ;;  %p152_p4 = scmp.eq.s32.totalorder %s3426_s23, 1 }
   0x8   : > { %s3988_s27 = scalar_select %p133_p1, %s3898_s20, %s135_s25  }
   0x9   : > { %p3990_p5 = por %p146_p2, %p145_p0  ;;  %p3994_p6 = por %p152_p4, %p151_p3 }
   0xa   : > { %p3429_p7 = scmp.ge.s32.totalorder %s3902_s21, 1  ;;  %p190_p8 = scmp.lt.s32.totalorder %s3902_s21, 3 }
   0xc   : > { %p191_p9 = pnand %p3429_p7, %p190_p8 }
   0xd   : > { %p218_p10 = scmp.lt.s32.totalorder (!%p191_p9), %s3973_s22, 1  ;;  %s3904_s10 = smov (!%p191_p9), 124   ;;  %v327_v28 = vlaneseq (!%p191_p9)  ;;  %v3905_v29 = vmov (!%p191_p9), 1983009808   ;;  %vm5245_vm0 = vcmask (!%p191_p9), 1040384   ;;  %vm810_vm1 = vcmask (!%p191_p9), 1043456  }
   0xe   : > { %194 = sbr.rel (%p191_p9) target bundleno = 1226 (0x4ca), region = 40  ;;  %v439_v30 = vunpack.c.l.s4 (!%p191_p9), %v3905_v29  ;;  %vm816_vm2 = vcmask (!%p191_p9), 1046528   ;;  %vm881_vm3 = vcmask (!%p191_p9), 1045504   ;;  %s3907_s11 = smov (!%p191_p9), 4   ;;  %vm3908_vm4 = vmmov (!%p191_p9), 1  }
   0xf   : > { %v4047_v35 = vshrl.u32 (!%p191_p9), %v327_v28, 7  ;;  %vm4172_vm5 = vmpackc.low (!%p191_p9), %vm810_vm1, %vm3908_vm4  ;;  %s3909_s16 = smov (!%p191_p9), 8   ;;  %vm960_vm6 = vcmask (!%p191_p9), 64512   ;;  %vm946_vm7 = vcmask (!%p191_p9), 31744   ;;  %vm989_vm8 = vcmask (!%p191_p9), 1044480   ;;  %s3916_s25 = smov (!%p191_p9), 24  }
  0x10   : > { %v440_v36 = vunpack.c.0.s8 (!%p191_p9), %v439_v30  ;;  %vm1011_vm9 = vcmask (!%p191_p9), 97280   ;;  %vm1313_vm10 = vcmask (!%p191_p9), 1042432   ;;  %s3917_s26 = smov (!%p191_p9), 32   ;;  %s3515_s8 = sshll.u32 (!%p191_p9), %s3973_s22, 7 }
  0x11   : > { %s5197_s14 = scalar_lea.hbm (!%p191_p9), %s5244_s5, %s3515_s8  ;;  %s3921_s17 = smov (!%p191_p9), [#allocation2]  }
  0x12   : > { %v4050_v43 = vsub.s32 (!%p191_p9), %v440_v36, %v4047_v35  ;;  %s3844_s23 = sshll.u32 (!%p191_p9), %s3921_s17, 4  ;;  %s3845_s23 = int_to_ptr.vmem [resolvable:$false] %s3844_s23 }
  0x15   : > { %s219_s30 = scalar_select %p218_p10, %s3973_s22, 1 }
  0x17   : > { %s3518_s6 = sshll.u32 %s219_s30, 7  ;;  %s3919_s30 = smov 40  }
  0x18   : > { %s4005_s9 = scalar_lea.vmem %s5239_s0, %s3518_s6  ;;  %s215_s6 = sand.u32 1, %s3894_s19  }
  0x19   : > { %v225_v0 = vld [vmem:[%s4005_s9 + $0x10] sm:$0xff]  ;;  %v223_v1 = vld [vmem:[%s4005_s9] sm:$0xff]  ;;  %v226_v2 = vld [vmem:[%s4005_s9 + $0x18] sm:$0xff]  ;;  %s3430_s7 = sshll.u32 %s215_s6, 3  ;;  %s3354_s15 = scalar_lea.sflag [#allocation3], %s215_s6 }
  0x1a   : > { %259 = vrot.lane.b32.xlu1 %v225_v0, %s3904_s10  ;;  %255 = vrot.lane.b32.xlu0 %v223_v1, %s3904_s10  ;;  %v224_v3 = vld [vmem:[%s4005_s9 + $0x8] sm:$0xff]  ;;  %v227_v5 = vld [vmem:[%s4005_s9 + $0x20] sm:$0xff] }
  0x1b   : > { %v228_v4 = vld [vmem:[%s4005_s9 + $0x28] sm:$0xff]  ;;  %v4014_v6 = vld [vmem:[%s4005_s9 + $0x38] sm:$0xff]  ;;  %v4017_v7 = vld [vmem:[%s4005_s9 + $0x30] sm:$0xff] }
  0x1c   : > { %v4022_v8 = vld [vmem:[%s4005_s9 + $0x48] sm:$0xff]  ;;  %v4025_v9 = vld [vmem:[%s4005_s9 + $0x40] sm:$0xff]  ;;  %v4030_v10 = vld [vmem:[%s4005_s9 + $0x58] sm:$0xff] }
  0x1d   : > { %v4033_v11 = vld [vmem:[%s4005_s9 + $0x50] sm:$0xff]  ;;  %v236_v12 = vld [vmem:[%s4005_s9 + $0x68] sm:$0xff]  ;;  %v235_v13 = vld [vmem:[%s4005_s9 + $0x60] sm:$0xff] }
  0x1e   : > { %261 = vrot.lane.b32.xlu1 %v226_v2, %s3904_s10  ;;  %257 = vrot.lane.b32.xlu0 %v224_v3, %s3904_s10  ;;  %v4040_v14 = vld [vmem:[%s4005_s9 + $0x78] sm:$0xff]  ;;  %v4043_v15 = vld [vmem:[%s4005_s9 + $0x70] sm:$0xff]  ;;  %s217_s9 = scalar_lea.vmem [#allocation2], %s3430_s7 }
  0x22   : > { %265 = vrot.lane.b32.xlu1 %v228_v4, %s3904_s10  ;;  %263 = vrot.lane.b32.xlu0 %v227_v5, %s3904_s10 }
  0x26   : > { %269 = vrot.lane.b32.xlu1 %v4014_v6, %s3904_s10  ;;  %267 = vrot.lane.b32.xlu0 %v4017_v7, %s3904_s10 }
  0x2a   : > { %273 = vrot.lane.b32.xlu1 %v4022_v8, %s3904_s10  ;;  %271 = vrot.lane.b32.xlu0 %v4025_v9, %s3904_s10 }
  0x2e   : > { %277 = vrot.lane.b32.xlu1 %v4030_v10, %s3904_s10  ;;  %275 = vrot.lane.b32.xlu0 %v4033_v11, %s3904_s10 }
  0x32   : > { %281 = vrot.lane.b32.xlu1 %v236_v12, %s3904_s10  ;;  %279 = vrot.lane.b32.xlu0 %v235_v13, %s3904_s10 }
  0x36   : > { %285 = vrot.lane.b32.xlu1 %v4040_v14, %s3904_s10  ;;  %283 = vrot.lane.b32.xlu0 %v4043_v15, %s3904_s10  ;;  %s3367_s10 = sshll.u32 %s217_s9, 4  ;;  %s5199_s10 = int_to_ptr.vmem [resolvable:$true] %s3367_s10 }
  0x37   : > { %s3840_s22 = scalar_lea.vmem %s5199_s10, 128  ;;  %p3847_p0 = scmp.lt.s32.totalorder %s5199_s10, %s3845_s23 }
  0x38   : > { %p3841_p11 = scmp.ne.s32.totalorder %s5199_s10, %s3840_s22 }
  0x3a   : > { %p3842_p12 = pnand %p3841_p11, %p3990_p5 }
  0x3c   : > { %p3843_p13 = pneg %p3842_p12 }
  0x8c   : > { %v260_v16 = vpop.permute.xlu1 %259  ;;  %v256_v17 = vpop.permute.xlu0 %255 }
  0x8d   : > { %v305_v26 = vmax.f32 %v225_v0, %v260_v16  ;;  %v303_v27 = vmax.f32 %v223_v1, %v256_v17 }
  0x90   : > { %v262_v18 = vpop.permute.xlu1 %261  ;;  %v258_v19 = vpop.permute.xlu0 %257 }
  0x91   : > { %v306_v22 = vmax.f32 %v226_v2, %v262_v18  ;;  %v304_v23 = vmax.f32 %v224_v3, %v258_v19 }
  0x93   : > { %v320_v31 = vmax.f32 %v305_v26, %v306_v22  ;;  %v319_v32 = vmax.f32 %v303_v27, %v304_v23  ;;  %v3906_v27 = vmov 0.0  }
  0x94   : > { %v266_v20 = vpop.permute.xlu1 %265  ;;  %v264_v21 = vpop.permute.xlu0 %263  ;;  %v4085_v28 = vrot.slane %v3906_v27, 1 }
  0x95   : > { %v389_v37 = vrot.slane %v320_v31, 7  ;;  %v388_v38 = vrot.slane %v319_v32, 7  ;;  %v308_v39 = vmax.f32 %v228_v4, %v266_v20  ;;  %v307_v40 = vmax.f32 %v227_v5, %v264_v21 }
  0x97   : > { %v406_v44 = vsel %vm5245_vm0, 0.0, %v389_v37  ;;  %v405_v45 = vsel %vm5245_vm0, 0.0, %v388_v38  ;;  %v321_v46 = vmax.f32 %v307_v40, %v308_v39  ;;  %v413_v49 = vsel %vm5245_vm0, %v388_v38, 0.0 }
  0x98   : > { %v270_v24 = vpop.permute.xlu1 %269  ;;  %v268_v25 = vpop.permute.xlu0 %267  ;;  %v461_v50 = vcombine.high %v406_v44, %v406_v44  ;;  %v468_v51 = vrot.slane %v406_v44, %v4050_v43  ;;  %v437_v52 = vcombine.high %v405_v45, %v405_v45  ;;  %v444_v58 = vrot.slane %v405_v45, %v4050_v43 }
  0x99   : > { %v390_v54 = vrot.slane %v321_v46, 7  ;;  %v310_v55 = vmax.f32 %v4014_v6, %v270_v24  ;;  %v309_v56 = vmax.f32 %v4017_v7, %v268_v25  ;;  %v460_v61 = vrot.slane %v413_v49, %v4050_v43 }
  0x9a   : > { %v475_v0 = vrot.slane %v461_v50, %v4050_v43  ;;  %v476_v2 = vcombine.high %v468_v51, %v468_v51  ;;  %v451_v3 = vrot.slane %v437_v52, %v4050_v43  ;;  %v452_v6 = vcombine.high %v444_v58, %v444_v58 }
  0x9b   : > { %v407_v4 = vsel %vm5245_vm0, 0.0, %v390_v54  ;;  %v322_v5 = vmax.f32 %v309_v56, %v310_v55  ;;  %v414_v17 = vsel %vm5245_vm0, %v389_v37, 0.0  ;;  %v415_v29 = vsel %vm5245_vm0, %v390_v54, 0.0 }
  0x9c   : > { %v274_v33 = vpop.permute.xlu1 %273  ;;  %v272_v34 = vpop.permute.xlu0 %271  ;;  %v485_v18 = vcombine.high %v407_v4, %v407_v4  ;;  %v477_v20 = vcombine.high %v475_v0, %v475_v0  ;;  %v655_v21 = vcombine.low %v476_v2, %v475_v0  ;;  %v453_v22 = vcombine.high %v451_v3, %v451_v3 }
  0x9d   : > { %v312_v59 = vmax.f32 %v4022_v8, %v274_v33  ;;  %v311_v60 = vmax.f32 %v4025_v9, %v272_v34  ;;  %v391_v23 = vrot.slane %v322_v5, 7  ;;  %v629_v24 = vcombine.low %v444_v58, %v452_v6 }
  0x9e   : > { %v484_v26 = vrot.slane %v414_v17, %v4050_v43  ;;  %v499_v30 = vrot.slane %v485_v18, %v4050_v43  ;;  %v663_v34 = vrot.slane %v655_v21, %v4050_v43  ;;  %v638_v36 = vcombine.low %v451_v3, %v453_v22 }
  0x9f   : > { %v4067_v7 = vmax.f32 %v311_v60, %v312_v59  ;;  %v408_v37 = vsel %vm5245_vm0, 0.0, %v391_v23  ;;  %v636_v38 = vrot.slane %v629_v24, %v4050_v43 }
  0xa0   : > { %v278_v41 = vpop.permute.xlu1 %277  ;;  %v276_v42 = vpop.permute.xlu0 %275  ;;  %v656_v33 = vcombine.low %v477_v20, %v484_v26  ;;  %v516_v49 = vrot.slane %v408_v37, %v4050_v43  ;;  %v646_v56 = vrot.slane %v638_v36, %v4050_v43 }
  0xa1   : > { %v313_v16 = vmax.f32 %v4033_v11, %v276_v42 }
  0xa2   : > { %v670_v55 = vrot.slane %v656_v33, %v4050_v43  ;;  %v524_v3 = vcombine.high %v516_v49, %v516_v49 }
  0xa4   : > { %v282_v47 = vpop.permute.xlu1 %281  ;;  %v280_v48 = vpop.permute.xlu0 %279  ;;  %v4121_v21 = vcombine.low %v663_v34, %v670_v55 }
  0xa5   : > { %v316_v53 = vmax.f32 %v236_v12, %v282_v47  ;;  %v315_v57 = vmax.f32 %v235_v13, %v280_v48  ;;  %v4071_v12 = vcombine.low %v460_v61, %v468_v51  ;;  %v314_v13 = vmax.f32 %v4030_v10, %v278_v41 }
  0xa6   : > { %v501_v47 = vcombine.high %v499_v30, %v499_v30  ;;  %v509_v48 = vcombine.high %v408_v37, %v408_v37  ;;  %v508_v51 = vrot.slane %v415_v29, %v4050_v43  ;;  %v822_v37 = vrot.slane %v4121_v21, 1 }
  0xa7   : > { %v4063_v1 = vmax.f32 %v315_v57, %v316_v53  ;;  %v653_v10 = vrot.slane %v4071_v12, %v4050_v43  ;;  %v4082_v11 = vmax.f32 %v313_v16, %v314_v13  ;;  %v416_v57 = vsel %vm5245_vm0, %v391_v23, 0.0 }
  0xa8   : > { %v286_v62 = vpop.permute.xlu1 %285  ;;  %v284_v63 = vpop.permute.xlu0 %283  ;;  %v673_v0 = vcombine.low %v499_v30, %v501_v47  ;;  %v523_v2 = vrot.slane %v509_v48, %v4050_v43  ;;  %v976_v48 = vld [vmem:[%s5240_s1 + $0xc] sm:$0xff] }
  0xa9   : > { %v318_v8 = vmax.f32 %v4040_v14, %v286_v62  ;;  %v317_v9 = vmax.f32 %v4043_v15, %v284_v63  ;;  %v394_v19 = vrot.slane %v4063_v1, 7  ;;  %v492_v14 = vrot.slane %v407_v4, %v4050_v43 }
  0xaa   : > { %v392_v15 = vrot.slane %v4067_v7, 7  ;;  %v393_v42 = vrot.slane %v4082_v11, 7  ;;  %v4119_v20 = vcombine.low %v646_v56, %v653_v10  ;;  %v687_v23 = vrot.slane %v673_v0, %v4050_v43 }
  0xab   : > { %v326_v25 = vmax.f32 %v317_v9, %v318_v8  ;;  %v419_v31 = vsel %vm5245_vm0, %v394_v19, 0.0  ;;  %v500_v39 = vcombine.high %v492_v14, %v492_v14  ;;  %v637_v8 = vcombine.low %v636_v38, %v636_v38 }
  0xac   : > { %v409_v40 = vsel %vm5245_vm0, 0.0, %v392_v15  ;;  %v604_v44 = vrot.slane %v419_v31, %v4050_v43  ;;  %v410_v59 = vsel %vm5245_vm0, 0.0, %v393_v42  ;;  %v532_v9 = vrot.slane %v416_v57, %v4050_v43 }
  0xad   : > { %v395_v32 = vrot.slane %v326_v25, 7  ;;  %v540_v58 = vrot.slane %v409_v40, %v4050_v43  ;;  %v672_v63 = vcombine.low %v492_v14, %v500_v39  ;;  %v533_v12 = vcombine.high %v409_v40, %v409_v40 }
  0xae   : > { %v557_v16 = vcombine.high %v410_v59, %v410_v59  ;;  %v525_v24 = vcombine.high %v523_v2, %v523_v2  ;;  %v689_v14 = vcombine.low %v508_v51, %v516_v49  ;;  %v690_v25 = vcombine.low %v524_v3, %v523_v2  ;;  %v977_v49 = vld [vmem:[%s5240_s1 + $0x14] sm:$0xf] }
  0xaf   : > { %v412_v41 = vsel %vm5245_vm0, 0.0, %v395_v32  ;;  %v420_v50 = vsel %vm5245_vm0, %v395_v32, 0.0  ;;  %v548_v13 = vcombine.high %v540_v58, %v540_v58  ;;  %v680_v22 = vrot.slane %v672_v63, %v4050_v43 }
  0xb0   : > { %v605_v45 = vcombine.high %v412_v41, %v412_v41  ;;  %v612_v46 = vrot.slane %v412_v41, %v4050_v43  ;;  %v628_v61 = vrot.slane %v420_v50, %v4050_v43  ;;  %v4130_v29 = vsel %vm810_vm1, 0.0, %v637_v8 }
  0xb1   : > { %v417_v10 = vsel %vm5245_vm0, %v392_v15, 0.0  ;;  %v547_v30 = vrot.slane %v533_v12, %v4050_v43  ;;  %v571_v31 = vrot.slane %v557_v16, %v4050_v43  ;;  %v707_v33 = vcombine.low %v540_v58, %v548_v13 }
  0xb2   : > { %v619_v52 = vrot.slane %v605_v45, %v4050_v43  ;;  %v620_v53 = vcombine.high %v612_v46, %v612_v46  ;;  %v774_v54 = vcombine.low %v604_v44, %v612_v46  ;;  %v411_v34 = vsel %vm5245_vm0, 0.0, %v394_v19 }
  0xb3   : > { %v820_v36 = vrot.slane %v4119_v20, 1  ;;  %v818_v38 = vrot.slane %v4130_v29, 1  ;;  %v4149_v39 = vcombine.low %v680_v22, %v687_v23  ;;  %v704_v40 = vrot.slane %v690_v25, %v4050_v43 }
  0xb4   : > { %v621_v60 = vcombine.high %v619_v52, %v619_v52  ;;  %v775_v62 = vcombine.low %v620_v53, %v619_v52  ;;  %v782_v4 = vrot.slane %v774_v54, %v4050_v43  ;;  %v706_v1 = vcombine.low %v525_v24, %v532_v9 }
  0xb5   : > { %v556_v19 = vrot.slane %v417_v10, %v4050_v43  ;;  %v418_v41 = vsel %vm5245_vm0, %v393_v42, 0.0  ;;  %v549_v44 = vcombine.high %v547_v30, %v547_v30  ;;  %v564_v45 = vrot.slane %v410_v59, %v4050_v43 }
  0xb6   : > { %v789_v5 = vrot.slane %v775_v62, %v4050_v43  ;;  %v791_v6 = vcombine.low %v621_v60, %v628_v61  ;;  %v573_v46 = vcombine.high %v571_v31, %v571_v31  ;;  %v581_v47 = vcombine.high %v411_v34, %v411_v34 }
  0xb7   : > { %v883_v42 = vrot.slane %v4130_v29, 2  ;;  %v885_v50 = vrot.slane %v4119_v20, 2  ;;  %v3714_v51 = vpack.c.bf16 %v977_v49, %v976_v48  ;;  %v721_v52 = vrot.slane %v707_v33, %v4050_v43 }
  0xb8   : > { %v798_v17 = vrot.slane %v791_v6, %v4050_v43  ;;  %v4117_v18 = vcombine.low %v782_v4, %v789_v5  ;;  %v823_v53 = vsel %vm816_vm2, %v820_v36, %v822_v37  ;;  %v821_v54 = vsel %vm816_vm2, %v818_v38, %v820_v36 }
  0xb9   : > { %v824_v55 = vrot.slane %v4149_v39, 1  ;;  %v697_v57 = vrot.slane %v689_v14, %v4050_v43  ;;  %v580_v58 = vrot.slane %v418_v41, %v4050_v43  ;;  %v714_v59 = vrot.slane %v706_v1, %v4050_v43  ;;  %3716 = vmatprep.subr.msk.bf16.mxu0 %vm4172_vm5, %v3714_v51  ;;  %v975_v1 = vld [vmem:[%s5240_s1 + $0x8] sm:$0xf] }
  0xba   : > { %v4126_v26 = vsel %vm810_vm1, %v798_v17, 0.0  ;;  %v836_v11 = vrot.slane %v4117_v18, 1  ;;  %v723_v60 = vcombine.low %v547_v30, %v549_v44  ;;  %v572_v61 = vcombine.high %v564_v45, %v564_v45  ;;  %3719 = vmatpush3.bf16.msk.msra.mxu0 %vm4172_vm5, %v3714_v51 }
  0xbb   : > { %v838_v32 = vrot.slane %v4126_v26, 1  ;;  %v724_v62 = vcombine.low %v556_v19, %v564_v45  ;;  %v741_v63 = vcombine.low %v573_v46, %v580_v58  ;;  %v595_v0 = vrot.slane %v581_v47, %v4050_v43 }
  0xbc   : > { %v886_v2 = vsel %vm881_vm3, %v883_v42, %v885_v50  ;;  %v4187_v3 = vcombine.low %v697_v57, %v704_v40  ;;  %v825_v4 = vsel %vm816_vm2, %v822_v37, %v824_v55  ;;  %v887_v5 = vrot.slane %v4121_v21, 2  ;;  %v974_v40 = vld [vmem:[%s5240_s1] sm:$0xff] }
  0xbd   : > { %v840_v7 = vsel %vm816_vm2, %v838_v32, %v4085_v28  ;;  %v839_v15 = vsel %vm816_vm2, %v836_v11, %v838_v32  ;;  %v889_v6 = vrot.slane %v4149_v39, 2  ;;  %v4194_v8 = vcombine.low %v714_v59, %v721_v52 }
  0xbe   : > { %864 = vrot.lane.b32.xlu1 %v840_v7, %s3907_s11  ;;  %862 = vrot.lane.b32.xlu0 %v839_v15, %s3907_s11  ;;  %v588_v9 = vrot.slane %v411_v34, %v4050_v43  ;;  %v740_v12 = vcombine.low %v572_v61, %v571_v31  ;;  %v731_v13 = vrot.slane %v723_v60, %v4050_v43  ;;  %v826_v22 = vrot.slane %v4187_v3, 1 }
  0xbf   : > { %v738_v16 = vrot.slane %v724_v62, %v4050_v43  ;;  %v597_v17 = vcombine.high %v595_v0, %v595_v0  ;;  %v755_v23 = vrot.slane %v741_v63, %v4050_v43  ;;  %v890_v24 = vsel %vm881_vm3, %v887_v5, %v889_v6 }
  0xc0   : > { %v888_v14 = vsel %vm881_vm3, %v885_v50, %v887_v5  ;;  %v828_v25 = vrot.slane %v4194_v8, 1  ;;  %v596_v10 = vcombine.high %v588_v9, %v588_v9  ;;  %v748_v30 = vrot.slane %v740_v12, %v4050_v43 }
  0xc1   : > { %v758_v31 = vcombine.low %v595_v0, %v597_v17  ;;  %v827_v32 = vsel %vm816_vm2, %v824_v55, %v826_v22  ;;  %v891_v33 = vrot.slane %v4187_v3, 2  ;;  %v893_v36 = vrot.slane %v4194_v8, 2 }
  0xc2   : > { %846 = vrot.lane.b32.xlu1 %v823_v53, %s3907_s11  ;;  %844 = vrot.lane.b32.xlu0 %v821_v54, %s3907_s11  ;;  %v829_v34 = vsel %vm816_vm2, %v826_v22, %v828_v25  ;;  %v4213_v37 = vcombine.low %v731_v13, %v738_v16  ;;  %v4215_v7 = vcombine.low %v748_v30, %v755_v23  ;;  %v901_v61 = vrot.slane %v4117_v18, 2 }
  0xc3   : > { %v757_v15 = vcombine.low %v588_v9, %v596_v10  ;;  %v772_v19 = vrot.slane %v758_v31, %v4050_v43  ;;  %v4226_v41 = vpack.c.bf16 %v975_v1, %v974_v40  ;;  %v894_v44 = vsel %vm881_vm3, %v891_v33, %v893_v36 }
  0xc4   : > { %v892_v45 = vsel %vm881_vm3, %v889_v6, %v891_v33  ;;  %v830_v46 = vrot.slane %v4213_v37, 1  ;;  %v832_v47 = vrot.slane %v4215_v7, 1  ;;  %v895_v52 = vrot.slane %v4213_v37, 2 }
  0xc5   : > { %v765_v48 = vrot.slane %v757_v15, %v4050_v43  ;;  %3722 = vmatprep.subr.msk.bf16.mxu0 %vm4172_vm5, %v4226_v41  ;;  %v897_v53 = vrot.slane %v4215_v7, 2  ;;  %v903_v0 = vrot.slane %v4126_v26, 2 }
  0xc6   : > { %909 = vrot.lane.b32.xlu1 %v886_v2, %s3909_s16  ;;  %848 = vrot.lane.b32.xlu0 %v825_v4, %s3907_s11  ;;  %v833_v50 = vsel %vm816_vm2, %v830_v46, %v832_v47  ;;  %v831_v51 = vsel %vm816_vm2, %v828_v25, %v830_v46  ;;  %v896_v55 = vsel %vm881_vm3, %v893_v36, %v895_v52 }
  0xc7   : > { %v4238_v49 = vcombine.low %v765_v48, %v772_v19  ;;  %v898_v54 = vsel %vm881_vm3, %v895_v52, %v897_v53  ;;  %v904_v4 = vsel %vm881_vm3, %v901_v61, %v903_v0 }
  0xc9   : > { %v834_v57 = vrot.slane %v4238_v49, 1  ;;  %v899_v60 = vrot.slane %v4238_v49, 2 }
  0xca   : > { %913 = vrot.lane.b32.xlu1 %v890_v24, %s3909_s16  ;;  %911 = vrot.lane.b32.xlu0 %v888_v14, %s3909_s16 }
  0xcb   : > { %v837_v58 = vsel %vm816_vm2, %v834_v57, %v836_v11  ;;  %v835_v59 = vsel %vm816_vm2, %v832_v47, %v834_v57  ;;  %v902_v62 = vsel %vm881_vm3, %v899_v60, %v901_v61  ;;  %v900_v63 = vsel %vm881_vm3, %v897_v53, %v899_v60 }
  0xcc   : > { %v4265_v11 = vrot.slane %v3906_v27, 2  ;;  %v819_v27 = vsel %vm816_vm2, %v4085_v28, %v818_v38 }
  0xce   : > { %852 = vrot.lane.b32.xlu1 %v829_v34, %s3907_s11  ;;  %850 = vrot.lane.b32.xlu0 %v827_v32, %s3907_s11  ;;  %v905_v2 = vsel %vm881_vm3, %v903_v0, %v4265_v11  ;;  %v884_v5 = vsel %vm881_vm3, %v4265_v11, %v883_v42 }
  0xd2   : > { %917 = vrot.lane.b32.xlu1 %v894_v44, %s3909_s16  ;;  %915 = vrot.lane.b32.xlu0 %v892_v45, %s3909_s16 }
  0xd6   : > { %856 = vrot.lane.b32.xlu1 %v833_v50, %s3907_s11  ;;  %854 = vrot.lane.b32.xlu0 %v831_v51, %s3907_s11 }
  0xda   : > { %921 = vrot.lane.b32.xlu1 %v898_v54, %s3909_s16  ;;  %919 = vrot.lane.b32.xlu0 %v896_v55, %s3909_s16 }
  0xde   : > { %860 = vrot.lane.b32.xlu1 %v837_v58, %s3907_s11  ;;  %858 = vrot.lane.b32.xlu0 %v835_v59, %s3907_s11 }
  0xe2   : > { %925 = vrot.lane.b32.xlu1 %v902_v62, %s3909_s16  ;;  %923 = vrot.lane.b32.xlu0 %v900_v63, %s3909_s16 }
  0xe6   : > { %929 = vrot.lane.b32.xlu1 %v905_v2, %s3909_s16  ;;  %927 = vrot.lane.b32.xlu0 %v904_v4, %s3909_s16 }
  0xea   : > { %907 = vrot.lane.b32.xlu1 %v884_v5, %s3909_s16  ;;  %842 = vrot.lane.b32.xlu0 %v819_v27, %s3907_s11 }
  0xee   : > { %866 = vrot.lane.b32.xlu0 %v4085_v28, %s3907_s11  ;;  %931 = vrot.lane.b32.xlu1 %v4265_v11, %s3909_s16  ;;  %s3914_s11 = smov 16  }
 0x130   : > { %v4286_v6 = vpop.permute.xlu1 %864  ;;  %v4288_v9 = vpop.permute.xlu0 %862 }
 0x134   : > { %v847_v42 = vpop.permute.xlu1 %846  ;;  %v845_v12 = vpop.permute.xlu0 %844 }
 0x135   : > { %v948_v38 = vsel %vm946_vm7, %v4130_v29, %v845_v12  ;;  %v949_v22 = vsel %vm946_vm7, %v4119_v20, %v847_v42  ;;  %v1310_v29 = vld [vmem:[%s5240_s1 + $0x18] sm:$0xff]  ;;  %v1311_v20 = vld [vmem:[%s5240_s1 + $0x20] sm:$0xf]  ;;  %v958_v12 = vsel %vm946_vm7, %v4126_v26, %v4286_v6 }
 0x136   : > { %v4316_v15 = vpack.c.bf16 %v1311_v20, %v1310_v29 }
 0x138   : > { %v910_v13 = vpop.permute.xlu1 %909  ;;  %v849_v16 = vpop.permute.xlu0 %848 }
 0x139   : > { %v4293_v17 = vsel %vm960_vm6, %v948_v38, %v910_v13  ;;  %v950_v23 = vsel %vm946_vm7, %v4121_v21, %v849_v16 }
 0x13a   : > { %v990_v30 = vrot.slane %v4293_v17, 3 }
 0x13c   : > { %v914_v24 = vpop.permute.xlu1 %913  ;;  %v912_v14 = vpop.permute.xlu0 %911 }
 0x13d   : > { %v4300_v25 = vsel %vm960_vm6, %v950_v23, %v914_v24  ;;  %v4303_v10 = vsel %vm960_vm6, %v949_v22, %v912_v14 }
 0x13e   : > { %v993_v21 = vrot.slane %v4300_v25, 3  ;;  %v991_v31 = vrot.slane %v4303_v10, 3  ;;  %v1154_v20 = vrot.slane %v4303_v10, 1 }
 0x140   : > { %v853_v32 = vpop.permute.xlu1 %852  ;;  %v851_v33 = vpop.permute.xlu0 %850  ;;  %v992_v34 = vsel %vm989_vm8, %v990_v30, %v991_v31  ;;  %v994_v36 = vsel %vm989_vm8, %v991_v31, %v993_v21  ;;  %v1156_v31 = vrot.slane %v4300_v25, 1 }
 0x141   : > { %3598 = vmatprep.mubr.msk.f32.mxu0 %vm1011_vm9, %v992_v34  ;;  %v952_v40 = vsel %vm946_vm7, %v4187_v3, %v853_v32  ;;  %v951_v1 = vsel %vm946_vm7, %v4149_v39, %v851_v33 }
 0x142   : > { %3599 = vmatmul.mubr.msk.f32.vlgmr.msra.gmra.mrb[0].mxu0 %vm1011_vm9, %v994_v36 }
 0x143   : > { %3725 = vmatpush3.bf16.msk.msra.mxu0 %vm4172_vm5, %v4226_v41 }
 0x144   : > { %v918_v19 = vpop.permute.xlu1 %917  ;;  %v916_v44 = vpop.permute.xlu0 %915  ;;  %3728 = vmatprep.subr.msk.bf16.mxu0 %vm4172_vm5, %v4316_v15 }
 0x145   : > { %v4331_v45 = vsel %vm960_vm6, %v952_v40, %v918_v19  ;;  %v4334_v46 = vsel %vm960_vm6, %v951_v1, %v916_v44  ;;  %v1157_v1 = vsel %vm816_vm2, %v1154_v20, %v1156_v31 }
 0x146   : > { %v997_v41 = vrot.slane %v4331_v45, 3  ;;  %v995_v47 = vrot.slane %v4334_v46, 3  ;;  %v1158_v34 = vrot.slane %v4334_v46, 1  ;;  %v1160_v40 = vrot.slane %v4331_v45, 1 }
 0x148   : > { %v857_v3 = vpop.permute.xlu1 %856  ;;  %v855_v48 = vpop.permute.xlu0 %854  ;;  %v996_v39 = vsel %vm989_vm8, %v993_v21, %v995_v47  ;;  %v998_v50 = vsel %vm989_vm8, %v995_v47, %v997_v41  ;;  %v1152_v21 = vrot.slane %v4293_v17, 1  ;;  %v1159_v19 = vsel %vm816_vm2, %v1156_v31, %v1158_v34  ;;  %v4467_v31 = vld [vmem:[%s5242_s3] ss:$0 sm:$0xff] }
 0x149   : > { %3601 = vmatprep.mubr.msk.f32.mxu0 %vm1011_vm9, %v996_v39  ;;  %v954_v51 = vsel %vm946_vm7, %v4213_v37, %v857_v3  ;;  %v953_v52 = vsel %vm946_vm7, %v4194_v8, %v855_v48 }
 0x14a   : > { %3602 = vmatmul.mubr.msk.f32.gmra.mrb[2].mxu0 %vm1011_vm9, %v998_v50  ;;  %v1155_v36 = vsel %vm816_vm2, %v1152_v21, %v1154_v20  ;;  %v1315_v50 = vrot.slane %v4300_v25, 5 }
 0x14c   : > { %v922_v53 = vpop.permute.xlu1 %921  ;;  %v920_v54 = vpop.permute.xlu0 %919 }
 0x14d   : > { %v4347_v55 = vsel %vm960_vm6, %v954_v51, %v922_v53  ;;  %v4350_v57 = vsel %vm960_vm6, %v953_v52, %v920_v54  ;;  %v1314_v51 = vrot.slane %v4303_v10, 5  ;;  %v1317_v53 = vrot.slane %v4334_v46, 5 }
 0x14e   : > { %v1001_v58 = vrot.slane %v4347_v55, 3  ;;  %v999_v59 = vrot.slane %v4350_v57, 3  ;;  %v1162_v17 = vrot.slane %v4350_v57, 1  ;;  %v1164_v44 = vrot.slane %v4347_v55, 1 }
 0x14f   : > { %v1321_v25 = vrot.slane %v4350_v57, 5  ;;  %v1318_v10 = vsel %vm1313_vm10, %v1315_v50, %v1317_v53 }
 0x150   : > { %v861_v60 = vpop.permute.xlu1 %860  ;;  %v859_v61 = vpop.permute.xlu0 %858  ;;  %v1000_v62 = vsel %vm989_vm8, %v997_v41, %v999_v59  ;;  %v1002_v37 = vsel %vm989_vm8, %v999_v59, %v1001_v58  ;;  %v1161_v41 = vsel %vm816_vm2, %v1158_v34, %v1160_v40  ;;  %v1163_v3 = vsel %vm816_vm2, %v1160_v40, %v1162_v17 }
 0x151   : > { %3604 = vmatprep.mubr.msk.f32.mxu0 %vm1011_vm9, %v1000_v62  ;;  %v956_v8 = vsel %vm946_vm7, %v4238_v49, %v861_v60  ;;  %v955_v63 = vsel %vm946_vm7, %v4215_v7, %v859_v61  ;;  %v957_v7 = vsel %vm946_vm7, %v4117_v18, %v4288_v9  ;;  %v1316_v59 = vsel %vm1313_vm10, %v1314_v51, %v1315_v50 }
 0x152   : > { %3605 = vmatmul.mubr.msk.f32.gmra.mrb[4].mxu0 %vm1011_vm9, %v1002_v37  ;;  %v1323_v60 = vrot.slane %v4347_v55, 5 }
 0x154   : > { %v926_v0 = vpop.permute.xlu1 %925  ;;  %v924_v2 = vpop.permute.xlu0 %923  ;;  %v1324_v57 = vsel %vm1313_vm10, %v1321_v25, %v1323_v60 }
 0x155   : > { %v4363_v4 = vsel %vm960_vm6, %v956_v8, %v926_v0  ;;  %v4366_v5 = vsel %vm960_vm6, %v955_v63, %v924_v2 }
 0x156   : > { %v1005_v27 = vrot.slane %v4363_v4, 3  ;;  %v1003_v42 = vrot.slane %v4366_v5, 3  ;;  %v1166_v47 = vrot.slane %v4366_v5, 1  ;;  %v1168_v56 = vrot.slane %v4363_v4, 1 }
 0x157   : > { %v1327_v37 = vrot.slane %v4363_v4, 5 }
 0x158   : > { %v930_v49 = vpop.permute.xlu1 %929  ;;  %v928_v13 = vpop.permute.xlu0 %927  ;;  %v1004_v16 = vsel %vm989_vm8, %v1001_v58, %v1003_v42  ;;  %v1006_v38 = vsel %vm989_vm8, %v1003_v42, %v1005_v27  ;;  %v1167_v39 = vsel %vm816_vm2, %v1164_v44, %v1166_v47  ;;  %v1169_v52 = vsel %vm816_vm2, %v1166_v47, %v1168_v56 }
 0x159   : > { %v4379_v22 = vsel %vm960_vm6, %v958_v12, %v930_v49  ;;  %v4382_v23 = vsel %vm960_vm6, %v957_v7, %v928_v13  ;;  %3607 = vmatprep.mubr.msk.f32.mxu0 %vm1011_vm9, %v1004_v16  ;;  %v1319_v58 = vrot.slane %v4331_v45, 5  ;;  %v1325_v45 = vrot.slane %v4366_v5, 5 }
 0x15a   : > { %v1009_v26 = vrot.slane %v4379_v22, 3  ;;  %v1007_v6 = vrot.slane %v4382_v23, 3  ;;  %3608 = vmatmul.mubr.msk.f32.gmra.mrb[6].mxu0 %vm1011_vm9, %v1006_v38  ;;  %v1170_v48 = vrot.slane %v4382_v23, 1  ;;  %v1329_v63 = vrot.slane %v4382_v23, 5 }
 0x15b   : > { %v1320_v46 = vsel %vm1313_vm10, %v1317_v53, %v1319_v58  ;;  %v1322_v62 = vsel %vm1313_vm10, %v1319_v58, %v1321_v25  ;;  %v1326_v0 = vsel %vm1313_vm10, %v1323_v60, %v1325_v45  ;;  %v1331_v2 = vrot.slane %v4379_v22, 5 }
 0x15c   : > { %v908_v18 = vpop.permute.xlu1 %907  ;;  %v843_v9 = vpop.permute.xlu0 %842  ;;  %v1008_v24 = vsel %vm989_vm8, %v1005_v27, %v1007_v6  ;;  %v1010_v14 = vsel %vm989_vm8, %v1007_v6, %v1009_v26  ;;  %v1171_v54 = vsel %vm816_vm2, %v1168_v56, %v1170_v48  ;;  %v1328_v4 = vsel %vm1313_vm10, %v1325_v45, %v1327_v37 }
 0x15d   : > { %v947_v29 = vsel %vm946_vm7, 0.0, %v843_v9  ;;  %3610 = vmatprep.mubr.msk.f32.mxu0 %vm1011_vm9, %v1008_v24  ;;  %v1330_v42 = vsel %vm1313_vm10, %v1327_v37, %v1329_v63  ;;  %v1332_v12 = vsel %vm1313_vm10, %v1329_v63, %v1331_v2  ;;  %v3910_v49 = vmov 269488144  }
 0x15e   : > { %v961_v30 = vsel %vm960_vm6, %v947_v29, %v908_v18  ;;  %3611 = vmatmul.mubr.msk.f32.gmra.mrb[8].mxu0 %vm1011_vm9, %v1010_v14  ;;  %v331_v13 = vunpack.c.l.s4 %v3910_v49  ;;  %v3911_v16 = vmov 842150450   ;;  %v3912_v22 = vmov 1414812756  }
 0x15f   : > { %v1151_v32 = vrot.slane %v961_v30, 1  ;;  %v338_v38 = vunpack.c.l.s4 %v3911_v16  ;;  %v345_v23 = vunpack.c.l.s4 %v3912_v22  ;;  %v3913_v24 = vmov 1987475062  }
 0x160   : > { %v867_v61 = vpop.permute.xlu0 %866  ;;  %v932_v55 = vpop.permute.xlu1 %931  ;;  %v332_v26 = vunpack.c.0.s8 %v331_v13  ;;  %v352_v14 = vunpack.c.l.s4 %v3913_v24  ;;  %v329_v29 = vadd.s32 8, %v4047_v35 }
 0x161   : > { %v1153_v33 = vsel %vm816_vm2, %v1151_v32, %v1152_v21  ;;  %v959_v8 = vsel %vm946_vm7, 0.0, %v867_v61  ;;  %v339_v6 = vunpack.c.0.s8 %v338_v38  ;;  %v346_v18 = vunpack.c.0.s8 %v345_v23 }
 0x162   : > { %3617 = vmatprep.mubr.msk.f32.mxu0 %vm1011_vm9, %v1153_v33  ;;  %v973_v5 = vsel %vm960_vm6, %v959_v8, %v932_v55  ;;  %v335_v9 = vsub.s32 %v332_v26, %v4047_v35  ;;  %v353_v32 = vunpack.c.0.s8 %v352_v14 }
 0x163   : > { %3618 = vmatmul.mubr.msk.f32.vlgmr.msra.gmra.mrb[0].mxu0 %vm1011_vm9, %v1155_v36  ;;  %v1333_v27 = vrot.slane %v973_v5, 5  ;;  %v342_v20 = vsub.s32 %v339_v6, %v4047_v35  ;;  %v349_v30 = vsub.s32 %v346_v18, %v4047_v35 }
 0x164   : > { %3731 = vmatpush3.bf16.msk.msra.mxu0 %vm4172_vm5, %v4316_v15  ;;  %3620 = vmatprep.mubr.msk.f32.mxu0 %vm1011_vm9, %v1157_v1  ;;  %v1165_v15 = vsel %vm816_vm2, %v1162_v17, %v1164_v44  ;;  %v336_v21 = vrot.slane %v4047_v35, %v335_v9  ;;  %v364_v34 = vrot.slane %v329_v29, %v335_v9 }
 0x165   : > { %v1334_v7 = vsel %vm1313_vm10, %v1331_v2, %v1333_v27  ;;  %v343_v33 = vrot.slane %v4047_v35, %v342_v20  ;;  %v350_v36 = vrot.slane %v4047_v35, %v349_v30 }
 0x166   : > { %vm365_vm11 = vcmp.ge.s32.totalorder %v336_v21, 1  ;;  %vm369_vm13 = vcmp.ge.s32.totalorder %v364_v34, 1  ;;  %vm370_vm14 = vcmp.le.s32.totalorder %v336_v21, 8  ;;  %vm374_vm5 = vcmp.le.s32.totalorder %v364_v34, 8 }
 0x167   : > { %3621 = vmatmul.mubr.msk.f32.gmra.mrb[2].mxu0 %vm1011_vm9, %v1159_v19  ;;  %v356_v19 = vsub.s32 %v353_v32, %v4047_v35  ;;  %vm366_vm12 = vcmp.ge.s32.totalorder %v343_v33, 1  ;;  %vm367_vm15 = vcmp.ge.s32.totalorder %v350_v36, 1  ;;  %vm371_vm4 = vcmp.le.s32.totalorder %v343_v33, 8  ;;  %vm4485_vm0 = vmand %vm369_vm13, %vm374_vm5 }
 0x168   : > { %3623 = vmatprep.mubr.msk.f32.mxu0 %vm1011_vm9, %v1161_v41  ;;  %vm372_vm7 = vcmp.le.s32.totalorder %v350_v36, 8  ;;  %vm2868_vm5 = vcmask 1046534  }
 0x169   : > { %v357_v51 = vrot.slane %v4047_v35, %v356_v19  ;;  %vm4499_vm13 = vmand %vm367_vm15, %vm372_vm7 }
 0x16b   : > { %3624 = vmatmul.mubr.msk.f32.gmra.mrb[4].mxu0 %vm1011_vm9, %v1163_v3 }
 0x16c   : > { %3626 = vmatprep.mubr.msk.f32.mxu0 %vm1011_vm9, %v1165_v15 }
 0x16f   : > { %3627 = vmatmul.mubr.msk.f32.gmra.mrb[6].mxu0 %vm1011_vm9, %v1167_v39 }
 0x170   : > { %3629 = vmatprep.mubr.msk.f32.mxu0 %vm1011_vm9, %v1169_v52 }
 0x173   : > { %3630 = vmatmul.mubr.msk.f32.gmra.mrb[8].mxu0 %vm1011_vm9, %v1171_v54 }
 0x174   : > { %3636 = vmatprep.mubr.msk.f32.mxu0 %vm1011_vm9, %v1316_v59 }
 0x177   : > { %3637 = vmatmul.mubr.msk.f32.vlgmr.msra.gmra.mrb[0].mxu0 %vm1011_vm9, %v1318_v10 }
 0x178   : > { %3639 = vmatprep.mubr.msk.f32.mxu0 %vm1011_vm9, %v1320_v46 }
 0x17b   : > { %3640 = vmatmul.mubr.msk.f32.gmra.mrb[2].mxu0 %vm1011_vm9, %v1322_v62 }
 0x17c   : > { %3642 = vmatprep.mubr.msk.f32.mxu0 %vm1011_vm9, %v1324_v57 }
 0x17f   : > { %3643 = vmatmul.mubr.msk.f32.gmra.mrb[4].mxu0 %vm1011_vm9, %v1326_v0 }
 0x180   : > { %3645 = vmatprep.mubr.msk.f32.mxu0 %vm1011_vm9, %v1328_v4 }
 0x183   : > { %3646 = vmatmul.mubr.msk.f32.gmra.mrb[6].mxu0 %vm1011_vm9, %v1330_v42 }
 0x184   : > { %3648 = vmatprep.mubr.msk.f32.mxu0 %vm1011_vm9, %v1332_v12 }
 0x187   : > { %3649 = vmatmul.mubr.msk.f32.gmra.mrb[8].mxu0 %vm1011_vm9, %v1334_v7  ;;  %vm4477_vm9 = vmand %vm365_vm11, %vm370_vm14  ;;  %vm373_vm14 = vcmp.le.s32.totalorder %v357_v51, 8 }
 0x188   : > { %vm4492_vm11 = vmand %vm366_vm12, %vm371_vm4  ;;  %vm368_vm12 = vcmp.ge.s32.totalorder %v357_v51, 1  ;;  %vm2866_vm4 = vcmask 1044484  }
 0x189   : > { %vm4514_vm15 = vmand %vm368_vm12, %vm373_vm14  ;;  %vm3349_vm12 = vcmask 457728   ;;  %vm3351_vm14 = vcmask 523264  }
 0x24a   : > { %v3638_v40 = vpop.f32.mrb[0].mxu0 }
 0x24b   : > { %v1491_v1 = vadd.f32 %v3638_v40, %v4467_v31  ;;  %v1424_v17 = vpop.f32.mrb[1].mxu0 }
 0x24c   : > { %v1490_v44 = vadd.f32 %v4467_v31, %v1424_v17 }
 0x24d   : > { %v1501_v41 = vmax.f32 %v1491_v1, 0.0 }
 0x24e   : > { %v1500_v47 = vmax.f32 %v1490_v44, 0.0  ;;  %v3641_v3 = vpop.f32.mrb[2].mxu0 }
 0x24f   : > { %v1547_v56 = vcombine.high %v1501_v41, %v1501_v41  ;;  %v1554_v15 = vrot.slane %v1501_v41, %v4050_v43  ;;  %v1493_v48 = vadd.f32 %v3641_v3, %v4467_v31  ;;  %v1434_v39 = vpop.f32.mrb[3].mxu0 }
 0x250   : > { %v1530_v52 = vcombine.high %v1500_v47, %v1500_v47  ;;  %v1537_v53 = vrot.slane %v1500_v47, %v4050_v43  ;;  %v1492_v54 = vadd.f32 %v4467_v31, %v1434_v39 }
 0x251   : > { %v1561_v59 = vrot.slane %v1547_v56, %v4050_v43  ;;  %v1562_v25 = vcombine.high %v1554_v15, %v1554_v15  ;;  %v1503_v10 = vmax.f32 %v1493_v48, 0.0  ;;  %v1744_v0 = vsel %vm4485_vm0, %v1554_v15, 0.0 }
 0x252   : > { %v1544_v46 = vrot.slane %v1530_v52, %v4050_v43  ;;  %v1545_v61 = vcombine.high %v1537_v53, %v1537_v53  ;;  %v1502_v45 = vmax.f32 %v1492_v54, 0.0  ;;  %v3644_v62 = vpop.f32.mrb[4].mxu0  ;;  %v1740_v13 = vsel %vm4477_vm9, %v1537_v53, 0.0 }
 0x253   : > { %v1563_v57 = vcombine.high %v1561_v59, %v1561_v59  ;;  %v1745_v8 = vsel %vm4477_vm9, %v1562_v25, 0.0  ;;  %v1581_v55 = vcombine.high %v1503_v10, %v1503_v10  ;;  %v1444_v63 = vpop.f32.mrb[5].mxu0  ;;  %v1588_v42 = vrot.slane %v1503_v10, %v4050_v43 }
 0x254   : > { %v4507_v2 = vcombine.low %v1744_v0, %v1745_v8  ;;  %v1741_v5 = vsel %vm4492_vm11, %v1545_v61, 0.0  ;;  %v1546_v27 = vcombine.high %v1544_v46, %v1544_v46  ;;  %v1564_v12 = vcombine.high %v1502_v45, %v1502_v45 }
 0x255   : > { %v1747_v4 = vsel %vm4499_vm13, %v1563_v57, 0.0  ;;  %v1595_v16 = vrot.slane %v1581_v55, %v4050_v43  ;;  %v1746_v22 = vsel %vm4492_vm11, %v1561_v59, 0.0  ;;  %v1820_v23 = vcombine.low %v1740_v13, %v1741_v5 }
 0x256   : > { %v3647_v7 = vpop.f32.mrb[6].mxu0  ;;  %v1571_v26 = vrot.slane %v1502_v45, %v4050_v43  ;;  %v1844_v6 = vrot.slane %v4507_v2, %v4050_v43  ;;  %v1846_v18 = vcombine.low %v1746_v22, %v1747_v4  ;;  %v1742_v9 = vsel %vm4499_vm13, %v1544_v46, 0.0 }
 0x257   : > { %v1454_v38 = vpop.f32.mrb[7].mxu0  ;;  %v1743_v24 = vsel %vm4514_vm15, %v1546_v27, 0.0  ;;  %v1596_v14 = vcombine.high %v1588_v42, %v1588_v42  ;;  %v1578_v29 = vrot.slane %v1564_v12, %v4050_v43  ;;  %v1597_v21 = vcombine.high %v1595_v16, %v1595_v16 }
 0x258   : > { %v1579_v20 = vcombine.high %v1571_v26, %v1571_v26  ;;  %v1495_v32 = vadd.f32 %v3644_v62, %v4467_v31  ;;  %v1494_v33 = vadd.f32 %v4467_v31, %v1444_v63  ;;  %v1497_v34 = vadd.f32 %v3647_v7, %v4467_v31 }
 0x259   : > { %v4535_v40 = vrot.slane %v1820_v23, %v4050_v43  ;;  %v1580_v1 = vcombine.high %v1578_v29, %v1578_v29  ;;  %v1748_v17 = vsel %vm4514_vm15, %v1571_v26, 0.0  ;;  %v1829_v44 = vcombine.low %v1742_v9, %v1743_v24 }
 0x25a   : > { %v3650_v30 = vpop.f32.mrb[8].mxu0  ;;  %v1749_v19 = vsel %vm4485_vm0, %v1579_v20, 0.0  ;;  %v1505_v47 = vmax.f32 %v1495_v32, 0.0  ;;  %v1504_v3 = vmax.f32 %v1494_v33, 0.0  ;;  %v1854_v56 = vrot.slane %v1846_v18, %v4050_v43 }
 0x25b   : > { %v1464_v36 = vpop.f32.mrb[9].mxu0  ;;  %v1847_v41 = vcombine.low %v1748_v17, %v1749_v19  ;;  %v1752_v15 = vsel %vm4499_vm13, %v1588_v42, 0.0  ;;  %v1753_v48 = vsel %vm4514_vm15, %v1596_v14, 0.0  ;;  %v1507_v39 = vmax.f32 %v1497_v34, 0.0 }
 0x25c   : > { %v1755_v51 = vsel %vm4477_vm9, %v1597_v21, 0.0  ;;  %v1615_v53 = vcombine.high %v1505_v47, %v1505_v47  ;;  %v1622_v54 = vrot.slane %v1505_v47, %v4050_v43  ;;  %v1751_v59 = vsel %vm4492_vm11, %v1580_v1, 0.0 }
 0x25d   : > { %v1861_v52 = vrot.slane %v1847_v41, %v4050_v43  ;;  %v1598_v25 = vcombine.high %v1504_v3, %v1504_v3  ;;  %v1605_v10 = vrot.slane %v1504_v3, %v4050_v43  ;;  %v1649_v46 = vcombine.high %v1507_v39, %v1507_v39 }
 0x25e   : > { %v1754_v61 = vsel %vm4485_vm0, %v1595_v16, 0.0  ;;  %v1629_v62 = vrot.slane %v1615_v53, %v4050_v43  ;;  %v1630_v57 = vcombine.high %v1622_v54, %v1622_v54  ;;  %v4558_v8 = vcombine.low %v1752_v15, %v1753_v48 }
 0x25f   : > { %v4555_v45 = vcombine.low %v1854_v56, %v1861_v52  ;;  %v1750_v55 = vsel %vm4477_vm9, %v1578_v29, 0.0  ;;  %v1612_v63 = vrot.slane %v1598_v25, %v4050_v43  ;;  %v1613_v0 = vcombine.high %v1605_v10, %v1605_v10 }
 0x260   : > { %v1880_v5 = vcombine.low %v1754_v61, %v1755_v51  ;;  %v4563_v4 = vcombine.low %v1750_v55, %v1751_v59  ;;  %v1756_v27 = vsel %vm4492_vm11, %v1605_v10, 0.0  ;;  %v1496_v42 = vadd.f32 %v4467_v31, %v1454_v38 }
 0x261   : > { %v1631_v12 = vcombine.high %v1629_v62, %v1629_v62  ;;  %v1761_v7 = vsel %vm4492_vm11, %v1630_v57, 0.0  ;;  %v1757_v13 = vsel %vm4499_vm13, %v1613_v0, 0.0  ;;  %v1663_v16 = vrot.slane %v1649_v46, %v4050_v43 }
 0x262   : > { %v1828_v22 = vcombine.low %v4535_v40, %v4535_v40  ;;  %v1881_v23 = vcombine.low %v1756_v27, %v1757_v13  ;;  %v1656_v26 = vrot.slane %v1507_v39, %v4050_v43  ;;  %v1499_v18 = vadd.f32 %v3650_v30, %v4467_v31 }
 0x263   : > { %v1837_v9 = vrot.slane %v1829_v44, %v4050_v43  ;;  %v1878_v38 = vrot.slane %v4558_v8, %v4050_v43  ;;  %v1760_v24 = vsel %vm4477_vm9, %v1622_v54, 0.0  ;;  %v1614_v14 = vcombine.high %v1612_v63, %v1612_v63 }
 0x264   : > { %v1888_v29 = vrot.slane %v1880_v5, %v4050_v43  ;;  %v1871_v20 = vrot.slane %v4563_v4, %v4050_v43  ;;  %v4585_v21 = vcombine.low %v1760_v24, %v1761_v7  ;;  %v1895_v32 = vrot.slane %v1881_v23, %v4050_v43 }
 0x265   : > { %v1762_v30 = vsel %vm4499_vm13, %v1629_v62, 0.0  ;;  %v1763_v33 = vsel %vm4514_vm15, %v1631_v12, 0.0  ;;  %v1665_v34 = vcombine.high %v1663_v16, %v1663_v16  ;;  %v1506_v40 = vmax.f32 %v1496_v42, 0.0 }
 0x266   : > { %v1758_v1 = vsel %vm4514_vm15, %v1612_v63, 0.0  ;;  %v4594_v17 = vcombine.low %v1888_v29, %v1895_v32  ;;  %v1664_v19 = vcombine.high %v1656_v26, %v1656_v26  ;;  %v1509_v44 = vmax.f32 %v1499_v18, 0.0 }
 0x267   : > { %v1759_v41 = vsel %vm4485_vm0, %v1614_v14, 0.0  ;;  %v1632_v47 = vcombine.high %v1506_v40, %v1506_v40  ;;  %v1639_v3 = vrot.slane %v1506_v40, %v4050_v43  ;;  %v1498_v56 = vadd.f32 %v4467_v31, %v1464_v36 }
 0x268   : > { %v1912_v15 = vrot.slane %v4585_v21, %v4050_v43  ;;  %v1914_v48 = vcombine.low %v1762_v30, %v1763_v33  ;;  %v1690_v39 = vrot.slane %v1509_v44, %v4050_v43  ;;  %v4606_v51 = vcombine.low %v1837_v9, %v1844_v6 }
 0x269   : > { %v1771_v52 = vsel %vm4492_vm11, %v1665_v34, 0.0  ;;  %v1646_v53 = vrot.slane %v1632_v47, %v4050_v43  ;;  %v1647_v54 = vcombine.high %v1639_v3, %v1639_v3  ;;  %v1508_v59 = vmax.f32 %v1498_v56, 0.0 }
 0x26a   : > { %v1897_v25 = vcombine.low %v1758_v1, %v1759_v41  ;;  %v1768_v31 = vsel %vm4514_vm15, %v1656_v26, 0.0  ;;  %v1769_v36 = vsel %vm4485_vm0, %v1664_v19, 0.0  ;;  %v1770_v10 = vsel %vm4477_vm9, %v1663_v16, 0.0 }
 0x26b   : > { %v1648_v2 = vcombine.high %v1646_v53, %v1646_v53  ;;  %v1764_v6 = vsel %vm4485_vm0, %v1639_v3, 0.0  ;;  %v1765_v46 = vsel %vm4477_vm9, %v1647_v54, 0.0  ;;  %v1666_v61 = vcombine.high %v1508_v59, %v1508_v59 }
 0x26c   : > { %v1948_v62 = vcombine.low %v1770_v10, %v1771_v52  ;;  %v1915_v57 = vcombine.low %v1764_v6, %v1765_v46  ;;  %v1698_v55 = vcombine.high %v1690_v39, %v1690_v39  ;;  %v4622_v63 = vsel %vm810_vm1, 0.0, %v1828_v22  ;;  %v2159_v10 = vld [vmem:[%s5241_s2 + $0x18] sm:$0xff] }
 0x26d   : > { %v1766_v0 = vsel %vm4492_vm11, %v1646_v53, 0.0  ;;  %v1767_v5 = vsel %vm4499_vm13, %v1648_v2, 0.0  ;;  %v1673_v4 = vrot.slane %v1508_v59, %v4050_v43  ;;  %v1680_v27 = vrot.slane %v1666_v61, %v4050_v43  ;;  %v2160_v2 = vld [vmem:[%s5241_s2 + $0x20] sm:$0xff] }
 0x26e   : > { %v1922_v42 = vrot.slane %v1914_v48, %v4050_v43  ;;  %v1932_v12 = vcombine.low %v1768_v31, %v1769_v36  ;;  %v1929_v7 = vrot.slane %v1915_v57, %v4050_v43  ;;  %v1931_v13 = vcombine.low %v1766_v0, %v1767_v5 }
 0x26f   : > { %v1905_v16 = vrot.slane %v1897_v25, %v4050_v43  ;;  %v1681_v22 = vcombine.high %v1673_v4, %v1673_v4  ;;  %v1682_v23 = vcombine.high %v1680_v27, %v1680_v27  ;;  %v2067_v26 = vrot.slane %v4622_v63, 2 }
 0x270   : > { %v1956_v18 = vrot.slane %v1948_v62, %v4050_v43  ;;  %v4635_v9 = vcombine.low %v1922_v42, %v1929_v7  ;;  %v1683_v24 = vcombine.high %v1509_v44, %v1509_v44  ;;  %v1777_v14 = vsel %vm4499_vm13, %v1698_v55, 0.0  ;;  %v2161_v42 = vld [vmem:[%s5241_s2 + $0x28] sm:$0xff] }
 0x271   : > { %v1772_v29 = vsel %vm4499_vm13, %v1673_v4, 0.0  ;;  %v1773_v21 = vsel %vm4514_vm15, %v1681_v22, 0.0  ;;  %v1775_v32 = vsel %vm4477_vm9, %v1682_v23, 0.0  ;;  %v2069_v30 = vrot.slane %v4606_v51, 2 }
 0x272   : > { %v1939_v33 = vrot.slane %v1931_v13, %v4050_v43  ;;  %v1949_v34 = vcombine.low %v1772_v29, %v1773_v21  ;;  %v2005_v40 = vrot.slane %v4622_v63, 1  ;;  %v2007_v1 = vrot.slane %v4606_v51, 1 }
 0x273   : > { %v1774_v19 = vsel %vm4485_vm0, %v1680_v27, 0.0  ;;  %v2070_v37 = vsel %vm881_vm3, %v2067_v26, %v2069_v30  ;;  %v2009_v44 = vrot.slane %v4555_v45, 1  ;;  %v4658_v50 = vcombine.low %v1871_v20, %v1878_v38 }
 0x274   : > { %v1963_v41 = vrot.slane %v1949_v34, %v4050_v43  ;;  %v1965_v47 = vcombine.low %v1774_v19, %v1775_v32  ;;  %2092 = vrot.lane.b32.xlu1 %v2070_v37, %s3914_s11  ;;  %v2008_v3 = vsel %vm816_vm2, %v2005_v40, %v2007_v1  ;;  %v2071_v56 = vrot.slane %v4555_v45, 2 }
 0x275   : > { %v1946_v48 = vrot.slane %v1932_v12, %v4050_v43  ;;  %v1697_v52 = vrot.slane %v1683_v24, %v4050_v43  ;;  %v1776_v8 = vsel %vm4492_vm11, %v1690_v39, 0.0  ;;  %2030 = vrot.lane.b32.xlu0 %v2008_v3, %s3909_s16  ;;  %v4673_v53 = vcombine.low %v1905_v16, %v1912_v15  ;;  %v2157_v24 = vld [vmem:[%s5241_s2 + $0x8] sm:$0xff] }
 0x276   : > { %v1966_v38 = vcombine.low %v1776_v8, %v1777_v14  ;;  %v4671_v20 = vcombine.low %v1956_v18, %v1963_v41  ;;  %v2010_v54 = vsel %vm816_vm2, %v2007_v1, %v2009_v44  ;;  %v2073_v59 = vrot.slane %v4658_v50, 2  ;;  %v2156_v18 = vld [vmem:[%s5241_s2] sm:$0xff] }
 0x277   : > { %v4677_v25 = vcombine.low %v1939_v33, %v1946_v48  ;;  %v1973_v31 = vrot.slane %v1965_v47, %v4050_v43  ;;  %v2072_v36 = vsel %vm881_vm3, %v2069_v30, %v2071_v56  ;;  %v2011_v60 = vrot.slane %v4658_v50, 1 }
 0x278   : > { %2032 = vrot.lane.b32.xlu1 %v2010_v54, %s3909_s16  ;;  %v1699_v39 = vcombine.high %v1697_v52, %v1697_v52  ;;  %v1980_v15 = vrot.slane %v1966_v38, %v4050_v43  ;;  %v2074_v6 = vsel %vm881_vm3, %v2071_v56, %v2073_v59  ;;  %v2015_v46 = vrot.slane %v4673_v53, 1 }
 0x279   : > { %2094 = vrot.lane.b32.xlu0 %v2072_v36, %s3914_s11  ;;  %v2012_v61 = vsel %vm816_vm2, %v2009_v44, %v2011_v60  ;;  %v2013_v62 = vrot.slane %v4594_v17, 1  ;;  %v3732_v0 = vpack.c.bf16 %v2160_v2, %v2159_v10  ;;  %v1778_v5 = vsel %vm4514_vm15, %v1697_v52, 0.0 }
 0x27a   : > { %v4696_v57 = vcombine.low %v1973_v31, %v1980_v15  ;;  %v1779_v55 = vsel %vm4485_vm0, %v1699_v39, 0.0  ;;  %v2077_v27 = vrot.slane %v4673_v53, 2  ;;  %v2075_v58 = vrot.slane %v4594_v17, 2 }
 0x27b   : > { %v2016_v4 = vsel %vm816_vm2, %v2013_v62, %v2015_v46  ;;  %3733 = vmatprep.subr.bf16.mxu1 %v3732_v0  ;;  %v1982_v12 = vcombine.low %v1778_v5, %v1779_v55  ;;  %v2014_v7 = vsel %vm816_vm2, %v2011_v60, %v2013_v62  ;;  %v2019_v13 = vrot.slane %v4677_v25, 1 }
 0x27c   : > { %2096 = vrot.lane.b32.xlu1 %v2074_v6, %s3914_s11  ;;  %3735 = vmatpush3.bf16.msra.mxu1 %v3732_v0  ;;  %v2078_v49 = vsel %vm881_vm3, %v2075_v58, %v2077_v27  ;;  %v2076_v22 = vsel %vm881_vm3, %v2073_v59, %v2075_v58  ;;  %v2017_v23 = vrot.slane %v4635_v9, 1  ;;  %v4725_v14 = vpack.c.bf16 %v2157_v24, %v2156_v18 }
 0x27d   : > { %2034 = vrot.lane.b32.xlu0 %v2012_v61, %s3909_s16  ;;  %3655 = vmatprep.subr.mxu1 %v2161_v42  ;;  %v1989_v16 = vrot.slane %v1982_v12, %v4050_v43  ;;  %v2081_v21 = vrot.slane %v4677_v25, 2  ;;  %v2079_v30 = vrot.slane %v4635_v9, 2  ;;  %v2021_v37 = vrot.slane %v4671_v20, 1  ;;  %v2487_v12 = vld [vmem:[%s5241_s2 + $0x30] sm:$0xff] }
 0x27e   : > { %v2020_v29 = vsel %vm816_vm2, %v2017_v23, %v2019_v13  ;;  %v2018_v32 = vsel %vm816_vm2, %v2015_v46, %v2017_v23  ;;  %v2023_v41 = vrot.slane %v4696_v57, 1  ;;  %v2083_v3 = vrot.slane %v4671_v20, 2 }
 0x27f   : > { %v4733_v33 = vsel %vm810_vm1, %v1989_v16, 0.0  ;;  %v2082_v34 = vsel %vm881_vm3, %v2079_v30, %v2081_v21  ;;  %v2080_v19 = vsel %vm881_vm3, %v2077_v27, %v2079_v30  ;;  %v2022_v47 = vsel %vm816_vm2, %v2019_v13, %v2021_v37 }
 0x280   : > { %2038 = vrot.lane.b32.xlu1 %v2016_v4, %s3909_s16  ;;  %3656 = vmatpush3.msra.mxu1 %v2161_v42  ;;  %v2025_v1 = vrot.slane %v4733_v33, 1  ;;  %v2024_v56 = vsel %vm816_vm2, %v2021_v37, %v2023_v41  ;;  %v2085_v48 = vrot.slane %v4696_v57, 2  ;;  %v2084_v52 = vsel %vm881_vm3, %v2081_v21, %v2083_v3  ;;  %v2158_v42 = vld [vmem:[%s5241_s2 + $0x10] sm:$0xff] }
 0x281   : > { %2036 = vrot.lane.b32.xlu0 %v2014_v7, %s3909_s16  ;;  %3737 = vmatprep.subr.bf16.mxu1 %v4725_v14  ;;  %v2087_v38 = vrot.slane %v4733_v33, 2  ;;  %v2068_v36 = vsel %vm881_vm3, %v4265_v11, %v2067_v26  ;;  %v2006_v60 = vsel %vm816_vm2, %v4085_v28, %v2005_v40  ;;  %vm2142_vm0 = vcmask 130048  }
 0x282   : > { %v2027_v44 = vsel %vm816_vm2, %v2025_v1, %v4085_v28  ;;  %v2086_v8 = vsel %vm881_vm3, %v2083_v3, %v2085_v48  ;;  %v2026_v54 = vsel %vm816_vm2, %v2023_v41, %v2025_v1  ;;  %vm2194_vm1 = vcmask 195584  }
 0x283   : > { %v2089_v59 = vsel %vm881_vm3, %v2087_v38, %v4265_v11  ;;  %v2088_v31 = vsel %vm881_vm3, %v2085_v48, %v2087_v38  ;;  %vm5260_vm3 = vcmask 1040384   ;;  %vm3343_vm9 = vcmask 261120  }
 0x284   : > { %2100 = vrot.lane.b32.xlu1 %v2078_v49, %s3914_s11  ;;  %vm3345_vm11 = vcmask 326656   ;;  %vm3347_vm13 = vcmask 392192  }
 0x285   : > { %2098 = vrot.lane.b32.xlu0 %v2076_v22, %s3914_s11 }
 0x288   : > { %2042 = vrot.lane.b32.xlu1 %v2020_v29, %s3909_s16 }
 0x289   : > { %2040 = vrot.lane.b32.xlu0 %v2018_v32, %s3909_s16 }
 0x28c   : > { %2104 = vrot.lane.b32.xlu1 %v2082_v34, %s3914_s11 }
 0x28d   : > { %2102 = vrot.lane.b32.xlu0 %v2080_v19, %s3914_s11 }
 0x290   : > { %2050 = vrot.lane.b32.xlu1 %v2027_v44, %s3909_s16 }
 0x291   : > { %2044 = vrot.lane.b32.xlu0 %v2022_v47, %s3909_s16 }
 0x294   : > { %2046 = vrot.lane.b32.xlu1 %v2024_v56, %s3909_s16 }
 0x295   : > { %2106 = vrot.lane.b32.xlu0 %v2084_v52, %s3914_s11 }
 0x298   : > { %2108 = vrot.lane.b32.xlu1 %v2086_v8, %s3914_s11 }
 0x299   : > { %2048 = vrot.lane.b32.xlu0 %v2026_v54, %s3909_s16 }
 0x29c   : > { %2112 = vrot.lane.b32.xlu1 %v2089_v59, %s3914_s11 }
 0x29d   : > { %2110 = vrot.lane.b32.xlu0 %v2088_v31, %s3914_s11 }
 0x2a0   : > { %2090 = vrot.lane.b32.xlu1 %v2068_v36, %s3914_s11 }
 0x2a1   : > { %2028 = vrot.lane.b32.xlu0 %v2006_v60, %s3909_s16 }
 0x2a4   : > { %2114 = vrot.lane.b32.xlu1 %v4265_v11, %s3914_s11 }
 0x2a5   : > { %2052 = vrot.lane.b32.xlu0 %v4085_v28, %s3909_s16 }
 0x2e6   : > { %v2093_v39 = vpop.permute.xlu1 %2092 }
 0x2e7   : > { %v2031_v15 = vpop.permute.xlu0 %2030 }
 0x2e8   : > { %v2130_v26 = vsel %vm960_vm6, %v4622_v63, %v2031_v15 }
 0x2e9   : > { %v4782_v10 = vsel %vm2142_vm0, %v2130_v26, %v2093_v39 }
 0x2ea   : > { %v2033_v40 = vpop.permute.xlu1 %2032  ;;  %v2173_v28 = vrot.slane %v4782_v10, 3 }
 0x2eb   : > { %v2131_v2 = vsel %vm960_vm6, %v4606_v51, %v2033_v40  ;;  %v2095_v6 = vpop.permute.xlu0 %2094 }
 0x2ec   : > { %v4787_v46 = vsel %vm2142_vm0, %v2131_v2, %v2095_v6 }
 0x2ed   : > { %v2174_v11 = vrot.slane %v4787_v46, 3 }
 0x2ee   : > { %v2097_v61 = vpop.permute.xlu1 %2096 }
 0x2ef   : > { %v2035_v62 = vpop.permute.xlu0 %2034  ;;  %v2175_v63 = vsel %vm989_vm8, %v2173_v28, %v2174_v11 }
 0x2f0   : > { %v2132_v55 = vsel %vm960_vm6, %v4555_v45, %v2035_v62  ;;  %3657 = vmatprep.mubr.msk.f32.mxu1 %vm2194_vm1, %v2175_v63  ;;  %v2488_v45 = vld [vmem:[%s5241_s2 + $0x38] sm:$0xff]  ;;  %v2334_v63 = vrot.slane %v4787_v46, 1 }
 0x2f1   : > { %v4796_v51 = vsel %vm2142_vm0, %v2132_v55, %v2097_v61  ;;  %v4818_v22 = vpack.c.bf16 %v2488_v45, %v2487_v12  ;;  %v2489_v45 = vld [vmem:[%s5241_s2 + $0x40] sm:$0xff] }
 0x2f2   : > { %v2176_v0 = vrot.slane %v4796_v51, 3  ;;  %v2039_v5 = vpop.permute.xlu1 %2038 }
 0x2f3   : > { %v2037_v4 = vpop.permute.xlu0 %2036  ;;  %v2134_v7 = vsel %vm960_vm6, %v4594_v17, %v2039_v5  ;;  %v2336_v5 = vrot.slane %v4796_v51, 1 }
 0x2f4   : > { %v2177_v27 = vsel %vm989_vm8, %v2174_v11, %v2176_v0  ;;  %v2133_v49 = vsel %vm960_vm6, %v4658_v50, %v2037_v4 }
 0x2f5   : > { %3658 = vmatmul.mubr.msk.f32.vlgmr.msra.gmra.mrb[0].mxu1 %vm2194_vm1, %v2177_v27 }
 0x2f6   : > { %v2101_v58 = vpop.permute.xlu1 %2100  ;;  %3739 = vmatpush3.bf16.msra.mxu1 %v4725_v14 }
 0x2f7   : > { %v4816_v13 = vsel %vm2142_vm0, %v2134_v7, %v2101_v58  ;;  %v2099_v16 = vpop.permute.xlu0 %2098  ;;  %3676 = vmatprep.subr.mxu1 %v2158_v42 }
 0x2f8   : > { %v2180_v23 = vrot.slane %v4816_v13, 3  ;;  %v4822_v18 = vsel %vm2142_vm0, %v2133_v49, %v2099_v16  ;;  %v2340_v7 = vrot.slane %v4816_v13, 1 }
 0x2f9   : > { %v2178_v17 = vrot.slane %v4822_v18, 3 }
 0x2fa   : > { %v2043_v24 = vpop.permute.xlu1 %2042  ;;  %3677 = vmatpush3.msra.mxu1 %v2158_v42  ;;  %v2338_v42 = vrot.slane %v4822_v18, 1 }
 0x2fb   : > { %v2041_v14 = vpop.permute.xlu0 %2040  ;;  %v2179_v29 = vsel %vm989_vm8, %v2176_v0, %v2178_v17  ;;  %v2181_v50 = vsel %vm989_vm8, %v2178_v17, %v2180_v23  ;;  %3741 = vmatprep.subr.bf16.mxu1 %v4818_v22  ;;  %v2136_v21 = vsel %vm960_vm6, %v4635_v9, %v2043_v24  ;;  %v2332_v0 = vrot.slane %v4782_v10, 1 }
 0x2fc   : > { %3660 = vmatprep.mubr.msk.f32.mxu1 %vm2194_vm1, %v2179_v29  ;;  %v2135_v30 = vsel %vm960_vm6, %v4673_v53, %v2041_v14  ;;  %v2337_v10 = vsel %vm816_vm2, %v2334_v63, %v2336_v5  ;;  %v2339_v49 = vsel %vm816_vm2, %v2336_v5, %v2338_v42 }
 0x2fd   : > { %3661 = vmatmul.mubr.msk.f32.gmra.mrb[2].mxu1 %vm2194_vm1, %v2181_v50  ;;  %v2335_v12 = vsel %vm816_vm2, %v2332_v0, %v2334_v63 }
 0x2fe   : > { %v2105_v32 = vpop.permute.xlu1 %2104 }
 0x2ff   : > { %v4835_v34 = vsel %vm2142_vm0, %v2136_v21, %v2105_v32  ;;  %v2103_v1 = vpop.permute.xlu0 %2102  ;;  %v2492_v21 = vrot.slane %v4796_v51, 5 }
 0x300   : > { %v2184_v19 = vrot.slane %v4835_v34, 3  ;;  %v4839_v37 = vsel %vm2142_vm0, %v2135_v30, %v2103_v1  ;;  %v2344_v16 = vrot.slane %v4835_v34, 1  ;;  %v2491_v30 = vrot.slane %v4787_v46, 5 }
 0x301   : > { %v2182_v44 = vrot.slane %v4839_v37, 3  ;;  %v2342_v58 = vrot.slane %v4839_v37, 1  ;;  %v2494_v1 = vrot.slane %v4822_v18, 5  ;;  %v2498_v51 = vrot.slane %v4839_v37, 5 }
 0x302   : > { %v2051_v41 = vpop.permute.xlu1 %2050 }
 0x303   : > { %v2045_v47 = vpop.permute.xlu0 %2044  ;;  %v2183_v3 = vsel %vm989_vm8, %v2180_v23, %v2182_v44  ;;  %v2185_v9 = vsel %vm989_vm8, %v2182_v44, %v2184_v19  ;;  %v2341_v23 = vsel %vm816_vm2, %v2338_v42, %v2340_v7  ;;  %v2345_v14 = vsel %vm816_vm2, %v2342_v58, %v2344_v16 }
 0x304   : > { %3663 = vmatprep.mubr.msk.f32.mxu1 %vm2194_vm1, %v2183_v3  ;;  %v2137_v56 = vsel %vm960_vm6, %v4677_v25, %v2045_v47  ;;  %v2140_v25 = vsel %vm960_vm6, %v4733_v33, %v2051_v41  ;;  %v2496_v44 = vrot.slane %v4816_v13, 5  ;;  %v2493_v41 = vsel %vm1313_vm10, %v2491_v30, %v2492_v21 }
 0x305   : > { %3664 = vmatmul.mubr.msk.f32.gmra.mrb[4].mxu1 %vm2194_vm1, %v2185_v9  ;;  %v2495_v47 = vsel %vm1313_vm10, %v2492_v21, %v2494_v1  ;;  %v2500_v3 = vrot.slane %v4835_v34, 5 }
 0x306   : > { %v2047_v53 = vpop.permute.xlu1 %2046  ;;  %v2497_v46 = vsel %vm1313_vm10, %v2494_v1, %v2496_v44  ;;  %v2499_v9 = vsel %vm1313_vm10, %v2496_v44, %v2498_v51 }
 0x307   : > { %v2107_v48 = vpop.permute.xlu0 %2106  ;;  %v2138_v38 = vsel %vm960_vm6, %v4671_v20, %v2047_v53  ;;  %v2501_v37 = vsel %vm1313_vm10, %v2498_v51, %v2500_v3 }
 0x308   : > { %v4849_v52 = vsel %vm2142_vm0, %v2137_v56, %v2107_v48 }
 0x309   : > { %v2186_v8 = vrot.slane %v4849_v52, 3  ;;  %v2346_v17 = vrot.slane %v4849_v52, 1  ;;  %v2502_v13 = vrot.slane %v4849_v52, 5 }
 0x30a   : > { %v2109_v54 = vpop.permute.xlu1 %2108 }
 0x30b   : > { %v4855_v59 = vsel %vm2142_vm0, %v2138_v38, %v2109_v54  ;;  %v2049_v31 = vpop.permute.xlu0 %2048  ;;  %v2187_v36 = vsel %vm989_vm8, %v2184_v19, %v2186_v8  ;;  %v2347_v50 = vsel %vm816_vm2, %v2344_v16, %v2346_v17 }
 0x30c   : > { %v2188_v60 = vrot.slane %v4855_v59, 3  ;;  %3666 = vmatprep.mubr.msk.f32.mxu1 %vm2194_vm1, %v2187_v36  ;;  %v2139_v20 = vsel %vm960_vm6, %v4696_v57, %v2049_v31  ;;  %v2348_v24 = vrot.slane %v4855_v59, 1  ;;  %v2504_v53 = vrot.slane %v4855_v59, 5 }
 0x30e   : > { %v2113_v39 = vpop.permute.xlu1 %2112  ;;  %v2189_v15 = vsel %vm989_vm8, %v2186_v8, %v2188_v60  ;;  %v2349_v32 = vsel %vm816_vm2, %v2346_v17, %v2348_v24  ;;  %v2503_v8 = vsel %vm1313_vm10, %v2500_v3, %v2502_v13  ;;  %v2505_v54 = vsel %vm1313_vm10, %v2502_v13, %v2504_v53 }
 0x30f   : > { %v4866_v26 = vsel %vm2142_vm0, %v2140_v25, %v2113_v39  ;;  %v2111_v40 = vpop.permute.xlu0 %2110  ;;  %3667 = vmatmul.mubr.msk.f32.gmra.mrb[6].mxu1 %vm2194_vm1, %v2189_v15  ;;  %v4949_v25 = vld [vmem:[%s5243_s4] ss:$0 sm:$0xff]  ;;  %v3915_v39 = vmov 1934713408  }
 0x310   : > { %v2192_v2 = vrot.slane %v4866_v26, 3  ;;  %v4871_v6 = vsel %vm2142_vm0, %v2139_v20, %v2111_v40  ;;  %v2508_v38 = vrot.slane %v4866_v26, 5  ;;  %v3008_v15 = vunpack.c.l.s4 %v3915_v39 }
 0x311   : > { %v2190_v11 = vrot.slane %v4871_v6, 3  ;;  %v2350_v29 = vrot.slane %v4871_v6, 1  ;;  %v2506_v48 = vrot.slane %v4871_v6, 5 }
 0x312   : > { %v2091_v33 = vpop.permute.xlu1 %2090  ;;  %v3009_v6 = vunpack.c.0.s8 %v3008_v15 }
 0x313   : > { %v2029_v28 = vpop.permute.xlu0 %2028  ;;  %v2191_v61 = vsel %vm989_vm8, %v2188_v60, %v2190_v11  ;;  %v2193_v62 = vsel %vm989_vm8, %v2190_v11, %v2192_v2  ;;  %v2351_v19 = vsel %vm816_vm2, %v2348_v24, %v2350_v29  ;;  %v2507_v31 = vsel %vm1313_vm10, %v2504_v53, %v2506_v48 }
 0x314   : > { %v2129_v57 = vsel %vm960_vm6, 0.0, %v2029_v28  ;;  %3669 = vmatprep.mubr.msk.f32.mxu1 %vm2194_vm1, %v2191_v61  ;;  %v2509_v36 = vsel %vm1313_vm10, %v2506_v48, %v2508_v38 }
 0x315   : > { %v2143_v55 = vsel %vm2142_vm0, %v2129_v57, %v2091_v33  ;;  %3670 = vmatmul.mubr.msk.f32.gmra.mrb[8].mxu1 %vm2194_vm1, %v2193_v62 }
 0x316   : > { %v2331_v4 = vrot.slane %v2143_v55, 1  ;;  %v2115_v34 = vpop.permute.xlu1 %2114 }
 0x317   : > { %v2053_v18 = vpop.permute.xlu0 %2052 }
 0x318   : > { %v2333_v27 = vsel %vm816_vm2, %v2331_v4, %v2332_v0  ;;  %v2141_v56 = vsel %vm960_vm6, 0.0, %v2053_v18  ;;  %v4959_v4 = vsub.s32 %v3009_v6, %v4047_v35 }
 0x319   : > { %3678 = vmatprep.mubr.msk.f32.mxu1 %vm2194_vm1, %v2333_v27  ;;  %v2155_v52 = vsel %vm2142_vm0, %v2141_v56, %v2115_v34 }
 0x31a   : > { %3679 = vmatmul.mubr.msk.f32.vlgmr.msra.gmra.mrb[0].mxu1 %vm2194_vm1, %v2335_v12  ;;  %v2510_v59 = vrot.slane %v2155_v52, 5 }
 0x31b   : > { %3743 = vmatpush3.bf16.msra.mxu1 %v4818_v22  ;;  %3681 = vmatprep.mubr.msk.f32.mxu1 %vm2194_vm1, %v2337_v10  ;;  %v2343_v22 = vsel %vm816_vm2, %v2340_v7, %v2342_v58  ;;  %vm2864_vm2 = vcmask 1042434  }
 0x31c   : > { %3697 = vmatprep.subr.mxu1 %v2489_v45  ;;  %v2511_v60 = vsel %vm1313_vm10, %v2508_v38, %v2510_v59  ;;  %vm2865_vm8 = vmor %vm5260_vm3, %vm2864_vm2 }
 0x31d   : > { %vm2867_vm10 = vmor %vm2865_vm8, %vm2866_vm4 }
 0x31e   : > { %3682 = vmatmul.mubr.msk.f32.gmra.mrb[2].mxu1 %vm2194_vm1, %v2339_v49  ;;  %vm4962_vm7 = vmor %vm2867_vm10, %vm2868_vm5 }
 0x31f   : > { %3684 = vmatprep.mubr.msk.f32.mxu1 %vm2194_vm1, %v2341_v23  ;;  %3698 = vmatpush3.msra.mxu1 %v2489_v45 }
 0x322   : > { %3685 = vmatmul.mubr.msk.f32.gmra.mrb[4].mxu1 %vm2194_vm1, %v2343_v22 }
 0x323   : > { %3687 = vmatprep.mubr.msk.f32.mxu1 %vm2194_vm1, %v2345_v14 }
 0x326   : > { %3688 = vmatmul.mubr.msk.f32.gmra.mrb[6].mxu1 %vm2194_vm1, %v2347_v50 }
 0x327   : > { %3690 = vmatprep.mubr.msk.f32.mxu1 %vm2194_vm1, %v2349_v32 }
 0x32a   : > { %3691 = vmatmul.mubr.msk.f32.gmra.mrb[8].mxu1 %vm2194_vm1, %v2351_v19 }
 0x32b   : > { %3699 = vmatprep.mubr.msk.f32.mxu1 %vm2194_vm1, %v2493_v41 }
 0x32e   : > { %3700 = vmatmul.mubr.msk.f32.vlgmr.msra.gmra.mrb[0].mxu1 %vm2194_vm1, %v2495_v47 }
 0x32f   : > { %3702 = vmatprep.mubr.msk.f32.mxu1 %vm2194_vm1, %v2497_v46 }
 0x332   : > { %3703 = vmatmul.mubr.msk.f32.gmra.mrb[2].mxu1 %vm2194_vm1, %v2499_v9 }
 0x333   : > { %3705 = vmatprep.mubr.msk.f32.mxu1 %vm2194_vm1, %v2501_v37 }
 0x336   : > { %3706 = vmatmul.mubr.msk.f32.gmra.mrb[4].mxu1 %vm2194_vm1, %v2503_v8 }
 0x337   : > { %3708 = vmatprep.mubr.msk.f32.mxu1 %vm2194_vm1, %v2505_v54 }
 0x33a   : > { %3709 = vmatmul.mubr.msk.f32.gmra.mrb[6].mxu1 %vm2194_vm1, %v2507_v31 }
 0x33b   : > { %3711 = vmatprep.mubr.msk.f32.mxu1 %vm2194_vm1, %v2509_v36 }
 0x33e   : > { %3712 = vmatmul.mubr.msk.f32.gmra.mrb[8].mxu1 %vm2194_vm1, %v2511_v60 }
 0x401   : > { %v3701_v20 = vpop.f32.mrb[0].mxu1 }
 0x402   : > { %v2665_v26 = vadd.f32 %v3701_v20, %v4949_v25  ;;  %v2598_v40 = vpop.f32.mrb[1].mxu1 }
 0x403   : > { %v2664_v2 = vadd.f32 %v4949_v25, %v2598_v40 }
 0x404   : > { %v2675_v11 = vmax.f32 %v2665_v26, 0.0 }
 0x405   : > { %v2674_v33 = vmax.f32 %v2664_v2, 0.0  ;;  %v3704_v28 = vpop.f32.mrb[2].mxu1 }
 0x406   : > { %v2711_v61 = vcombine.high %v2675_v11, %v2675_v11  ;;  %v2718_v62 = vrot.slane %v2675_v11, %v4050_v43  ;;  %v2667_v57 = vadd.f32 %v3704_v28, %v4949_v25  ;;  %v2608_v63 = vpop.f32.mrb[3].mxu1 }
 0x407   : > { %v2694_v55 = vcombine.high %v2674_v33, %v2674_v33  ;;  %v2701_v0 = vrot.slane %v2674_v33, %v4050_v43  ;;  %v2666_v5 = vadd.f32 %v4949_v25, %v2608_v63 }
 0x408   : > { %v2725_v27 = vrot.slane %v2711_v61, %v4050_v43  ;;  %v2726_v42 = vcombine.high %v2718_v62, %v2718_v62  ;;  %v2881_v12 = vrot.slane %v2718_v62, 7  ;;  %v2677_v45 = vmax.f32 %v2667_v57, 0.0 }
 0x409   : > { %v2708_v10 = vrot.slane %v2694_v55, %v4050_v43  ;;  %v2709_v58 = vcombine.high %v2701_v0, %v2701_v0  ;;  %v3498_v49 = vrot.slane %v2701_v0, 9  ;;  %v2676_v16 = vmax.f32 %v2666_v5, 0.0  ;;  %v3707_v23 = vpop.f32.mrb[4].mxu1 }
 0x40a   : > { %v2727_v17 = vcombine.high %v2725_v27, %v2725_v27  ;;  %v3499_v22 = vrot.slane %v2726_v42, 9  ;;  %v2885_v24 = vrot.slane %v2725_v27, 7  ;;  %v2745_v35 = vcombine.high %v2677_v45, %v2677_v45  ;;  %v2618_v14 = vpop.f32.mrb[5].mxu1 }
 0x40b   : > { %v2710_v29 = vcombine.high %v2708_v10, %v2708_v10  ;;  %v2872_v50 = vrot.slane %v2709_v58, 7  ;;  %v2875_v21 = vrot.slane %v2708_v10, 7  ;;  %v4968_v32 = vrot.slane %v2677_v45, %v4050_v43 }
 0x40c   : > { %v4972_v30 = vsel %vm4962_vm7, %v3499_v22, %v2885_v24  ;;  %v4974_v1 = vrot.slane %v2885_v24, 2  ;;  %v4976_v19 = vrot.slane %v2727_v17, 7  ;;  %v2759_v44 = vrot.slane %v2745_v35, %v4050_v43 }
 0x40d   : > { %v4981_v41 = vsel %vm4962_vm7, %v3498_v49, %v2872_v50  ;;  %v2874_v51 = vrot.slane %v2872_v50, 2  ;;  %v2877_v47 = vrot.slane %v2875_v21, 2  ;;  %v2878_v3 = vrot.slane %v2710_v29, 7  ;;  %v3710_v46 = vpop.f32.mrb[6].mxu1 }
 0x40e   : > { %v2889_v18 = vsel %vm4962_vm7, %v4974_v1, %v4976_v19  ;;  %v2890_v13 = vrot.slane %v4976_v19, 2  ;;  %v3006_v9 = vcombine.low %v4981_v41, %v4972_v30  ;;  %v2760_v53 = vcombine.high %v4968_v32, %v4968_v32  ;;  %v2628_v37 = vpop.f32.mrb[7].mxu1 }
 0x40f   : > { %v4994_v56 = vsel %vm4962_vm7, %v2874_v51, %v2875_v21  ;;  %v2880_v34 = vrot.slane %v2878_v3, 2  ;;  %v2761_v48 = vcombine.high %v2759_v44, %v2759_v44  ;;  %v2901_v8 = vrot.slane %v4968_v32, 7 }
 0x410   : > { %v4997_v38 = vrot.slane %v2760_v53, 7  ;;  %v2907_v52 = vrot.slane %v2759_v44, 7  ;;  %v2728_v54 = vcombine.high %v2676_v16, %v2676_v16  ;;  %v2735_v59 = vrot.slane %v2676_v16, %v4050_v43 }
 0x411   : > { %v5000_v31 = vrot.slane %v2901_v8, 2  ;;  %v3501_v36 = vrot.slane %v2761_v48, 9  ;;  %v2879_v60 = vsel %vm4962_vm7, %v2877_v47, %v2878_v3  ;;  %v2882_v39 = vsel %vm4962_vm7, %v2880_v34, %v2881_v12  ;;  %v3713_v15 = vpop.f32.mrb[8].mxu1 }
 0x412   : > { %v2906_v20 = vrot.slane %v4997_v38, 2  ;;  %v2742_v26 = vrot.slane %v2728_v54, %v4050_v43  ;;  %v2743_v40 = vcombine.high %v2735_v59, %v2735_v59  ;;  %v2891_v2 = vrot.slane %v2735_v59, 7  ;;  %v2638_v6 = vpop.f32.mrb[9].mxu1 }
 0x413   : > { %v2905_v11 = vsel %vm4962_vm7, %v5000_v31, %v4997_v38  ;;  %v2669_v33 = vadd.f32 %v3707_v23, %v4949_v25  ;;  %v2668_v28 = vadd.f32 %v4949_v25, %v2618_v14  ;;  %v2671_v61 = vadd.f32 %v3710_v46, %v4949_v25 }
 0x414   : > { %v5017_v62 = vsel %vm4962_vm7, %v2906_v20, %v2907_v52  ;;  %v2744_v57 = vcombine.high %v2742_v26, %v2742_v26  ;;  %v2892_v63 = vsel %vm4962_vm7, %v2890_v13, %v2891_v2  ;;  %v2893_v55 = vrot.slane %v2891_v2, 2 }
 0x415   : > { %v2894_v0 = vrot.slane %v2743_v40, 7  ;;  %v3500_v5 = vrot.slane %v2742_v26, 9  ;;  %v5021_v27 = vcombine.low %v2879_v60, %v2892_v63  ;;  %v2679_v42 = vmax.f32 %v2669_v33, 0.0 }
 0x416   : > { %v2898_v12 = vrot.slane %v2744_v57, 7  ;;  %v2678_v45 = vmax.f32 %v2668_v28, 0.0  ;;  %v2681_v10 = vmax.f32 %v2671_v61, 0.0  ;;  %v2670_v58 = vadd.f32 %v4949_v25, %v2628_v37 }
 0x417   : > { %v2895_v49 = vsel %vm4962_vm7, %v2893_v55, %v2894_v0  ;;  %v2779_v16 = vcombine.high %v2679_v42, %v2679_v42  ;;  %v2786_v23 = vrot.slane %v2679_v42, %v4050_v43  ;;  %v2673_v17 = vadd.f32 %v3713_v15, %v4949_v25 }
 0x418   : > { %v2900_v22 = vrot.slane %v2898_v12, 2  ;;  %v5028_v24 = vcombine.low %v2882_v39, %v2895_v49  ;;  %v2762_v35 = vcombine.high %v2678_v45, %v2678_v45  ;;  %v2769_v14 = vrot.slane %v2678_v45, %v4050_v43 }
 0x419   : > { %v2793_v29 = vrot.slane %v2779_v16, %v4050_v43  ;;  %v2794_v50 = vcombine.high %v2786_v23, %v2786_v23  ;;  %v3502_v21 = vrot.slane %v2786_v23, 9  ;;  %v5034_v32 = vsel %vm4962_vm7, %v3500_v5, %v2898_v12 }
 0x41a   : > { %v2776_v44 = vrot.slane %v2762_v35, %v4050_v43  ;;  %v2777_v51 = vcombine.high %v2769_v14, %v2769_v14  ;;  %v2902_v47 = vsel %vm4962_vm7, %v2900_v22, %v2901_v8  ;;  %v2911_v3 = vrot.slane %v2769_v14, 7 }
 0x41b   : > { %v2795_v46 = vcombine.high %v2793_v29, %v2793_v29  ;;  %v2924_v13 = vrot.slane %v2794_v50, 7  ;;  %v2927_v53 = vrot.slane %v2793_v29, 7  ;;  %v2813_v37 = vcombine.high %v2681_v10, %v2681_v10 }
 0x41c   : > { %v2778_v34 = vcombine.high %v2776_v44, %v2776_v44  ;;  %v5041_v48 = vsel %vm4962_vm7, %v3501_v36, %v2911_v3  ;;  %v2913_v52 = vrot.slane %v2911_v3, 2  ;;  %v2914_v54 = vrot.slane %v2777_v51, 7 }
 0x41d   : > { %v5045_v59 = vsel %vm4962_vm7, %v3502_v21, %v2924_v13  ;;  %v2926_v60 = vrot.slane %v2924_v13, 2  ;;  %v5047_v39 = vrot.slane %v2927_v53, 2  ;;  %v5049_v8 = vrot.slane %v2795_v46, 7 }
 0x41e   : > { %v2915_v15 = vsel %vm4962_vm7, %v2913_v52, %v2914_v54  ;;  %v2916_v20 = vrot.slane %v2914_v54, 2  ;;  %v2917_v26 = vrot.slane %v2776_v44, 7  ;;  %v5053_v40 = vrot.slane %v2778_v34, 7 }
 0x41f   : > { %v2928_v36 = vsel %vm4962_vm7, %v2926_v60, %v2927_v53  ;;  %v2931_v2 = vsel %vm4962_vm7, %v5047_v39, %v5049_v8  ;;  %v2932_v33 = vrot.slane %v5049_v8, 2  ;;  %v3015_v28 = vcombine.low %v5034_v32, %v5041_v48 }
 0x420   : > { %v5066_v61 = vsel %vm4962_vm7, %v2916_v20, %v2917_v26  ;;  %v5068_v57 = vrot.slane %v2917_v26, 2  ;;  %v3051_v63 = vcombine.low %v2902_v47, %v2915_v15  ;;  %v2820_v55 = vrot.slane %v2681_v10, %v4050_v43 }
 0x421   : > { %v2827_v0 = vrot.slane %v2813_v37, %v4050_v43  ;;  %v2680_v5 = vmax.f32 %v2670_v58, 0.0  ;;  %v2683_v42 = vmax.f32 %v2673_v17, 0.0  ;;  %v2672_v12 = vadd.f32 %v4949_v25, %v2638_v6 }
 0x422   : > { %v2921_v45 = vsel %vm4962_vm7, %v5068_v57, %v5053_v40  ;;  %v2828_v49 = vcombine.high %v2820_v55, %v2820_v55  ;;  %v2943_v16 = vrot.slane %v2820_v55, 7  ;;  %v3042_v10 = vcombine.low %v4994_v56, %v2889_v18 }
 0x423   : > { %v2829_v23 = vcombine.high %v2827_v0, %v2827_v0  ;;  %v3504_v22 = vrot.slane %v2827_v0, 9  ;;  %v2796_v58 = vcombine.high %v2680_v5, %v2680_v5  ;;  %v2803_v17 = vrot.slane %v2680_v5, %v4050_v43 }
 0x424   : > { %v2945_v25 = vrot.slane %v2943_v16, 2  ;;  %v2946_v6 = vrot.slane %v2828_v49, 7  ;;  %v2847_v35 = vcombine.high %v2683_v42, %v2683_v42  ;;  %v5085_v14 = vrot.slane %v2683_v42, %v4050_v43 }
 0x425   : > { %v2950_v29 = vrot.slane %v2829_v23, 7  ;;  %v2810_v50 = vrot.slane %v2796_v58, %v4050_v43  ;;  %v2811_v21 = vcombine.high %v2803_v17, %v2803_v17  ;;  %v2933_v44 = vrot.slane %v2803_v17, 7 }
 0x426   : > { %v2947_v1 = vsel %vm4962_vm7, %v2945_v25, %v2946_v6  ;;  %v2861_v19 = vrot.slane %v2847_v35, %v4050_v43  ;;  %v2862_v18 = vcombine.high %v5085_v14, %v5085_v14  ;;  %v2963_v56 = vrot.slane %v5085_v14, 7 }
 0x427   : > { %v5096_v51 = vsel %vm4962_vm7, %v3504_v22, %v2950_v29  ;;  %v2952_v47 = vrot.slane %v2950_v29, 2  ;;  %v2812_v3 = vcombine.high %v2810_v50, %v2810_v50  ;;  %v2934_v46 = vsel %vm4962_vm7, %v2932_v33, %v2933_v44 }
 0x428   : > { %v3503_v13 = vrot.slane %v2811_v21, 9  ;;  %v2937_v53 = vrot.slane %v2810_v50, 7  ;;  %v5100_v37 = vcombine.low %v2934_v46, %v2947_v1  ;;  %v2863_v34 = vcombine.high %v2861_v19, %v2861_v19 }
 0x429   : > { %v2940_v52 = vrot.slane %v2812_v3, 7  ;;  %v2965_v54 = vrot.slane %v2963_v56, 2  ;;  %v2966_v60 = vrot.slane %v2862_v18, 7  ;;  %v2969_v15 = vrot.slane %v2861_v19, 7 }
 0x42a   : > { %v2938_v20 = vsel %vm4962_vm7, %v3503_v13, %v2937_v53  ;;  %v2939_v26 = vrot.slane %v2937_v53, 2  ;;  %v5104_v55 = vrot.slane %v2863_v34, 7  ;;  %v2682_v0 = vmax.f32 %v2672_v12, 0.0 }
 0x42b   : > { %v2942_v5 = vrot.slane %v2940_v52, 2  ;;  %v3024_v42 = vcombine.low %v5045_v59, %v2938_v20  ;;  %v2967_v33 = vsel %vm4962_vm7, %v2965_v54, %v2966_v60  ;;  %v2968_v49 = vrot.slane %v2966_v60, 2 }
 0x42c   : > { %v2941_v23 = vsel %vm4962_vm7, %v2939_v26, %v2940_v52  ;;  %v2971_v22 = vrot.slane %v2969_v15, 2  ;;  %v2830_v58 = vcombine.high %v2682_v0, %v2682_v0  ;;  %v2837_v17 = vrot.slane %v2682_v0, %v4050_v43 }
 0x42d   : > { %v2970_v25 = vsel %vm4962_vm7, %v2968_v49, %v2969_v15  ;;  %v3049_v6 = vrot.slane %v3042_v10, %v4959_v4  ;;  %v3058_v12 = vrot.slane %v3051_v63, %v4959_v4  ;;  %v3060_v35 = vcombine.low %v2928_v36, %v2941_v23 }
 0x42e   : > { %v2973_v59 = vsel %vm4962_vm7, %v2971_v22, %v5104_v55  ;;  %v2844_v14 = vrot.slane %v2830_v58, %v4050_v43  ;;  %v2845_v29 = vcombine.high %v2837_v17, %v2837_v17  ;;  %v2953_v50 = vrot.slane %v2837_v17, 7 }
 0x42f   : > { %v3067_v21 = vrot.slane %v3060_v35, %v4959_v4  ;;  %v3508_v44 = vcombine.high %v3049_v6, %v3058_v12  ;;  %v3200_v1 = vcombine.low %v3049_v6, %v3058_v12  ;;  %v2944_v19 = vsel %vm4962_vm7, %v2942_v5, %v2943_v16 }
 0x430   : > { %v2846_v18 = vcombine.high %v2844_v14, %v2844_v14  ;;  %v2954_v63 = vsel %vm4962_vm7, %v2952_v47, %v2953_v50  ;;  %v2955_v36 = vrot.slane %v2953_v50, 2  ;;  %v2956_v10 = vrot.slane %v2845_v29, 7 }
 0x431   : > { %v2959_v3 = vrot.slane %v2844_v14, 7  ;;  %v3069_v46 = vcombine.low %v2954_v63, %v2967_v33  ;;  %v3232_v13 = vrot.slane %v3508_v44, %v4050_v43  ;;  %v3208_v53 = vrot.slane %v3200_v1, %v4050_v43 }
 0x432   : > { %v2957_v34 = vsel %vm4962_vm7, %v2955_v36, %v2956_v10  ;;  %v2958_v52 = vrot.slane %v2956_v10, 2  ;;  %v3505_v54 = vrot.slane %v2846_v18, 9  ;;  %v3085_v16 = vrot.slane %v5021_v27, %v4959_v4 }
 0x433   : > { %v3105_v60 = vcombine.low %v2957_v34, %v2970_v25  ;;  %v3076_v15 = vrot.slane %v3069_v46, %v4959_v4  ;;  %v3087_v47 = vcombine.low %v2905_v11, %v5066_v61  ;;  %v3096_v20 = vcombine.low %v2931_v2, %v2944_v19 }
 0x434   : > { %v2960_v26 = vsel %vm4962_vm7, %v2958_v52, %v2959_v3  ;;  %v2964_v27 = vsel %vm4962_vm7, %v3505_v54, %v2963_v56  ;;  %v3013_v55 = vrot.slane %v3006_v9, %v4959_v4  ;;  %v3022_v38 = vrot.slane %v3015_v28, %v4959_v4 }
 0x435   : > { %v3509_v31 = vcombine.high %v3067_v21, %v3076_v15  ;;  %v3201_v11 = vcombine.low %v3067_v21, %v3076_v15  ;;  %v3094_v39 = vrot.slane %v3087_v47, %v4959_v4  ;;  %v3103_v8 = vrot.slane %v3096_v20, %v4959_v4 }
 0x436   : > { %v3112_v2 = vrot.slane %v3105_v60, %v4959_v4  ;;  %v3031_v61 = vrot.slane %v3024_v42, %v4959_v4  ;;  %v3033_v56 = vcombine.low %v5096_v51, %v2964_v27  ;;  %v3506_v0 = vcombine.high %v3013_v55, %v3022_v38 }
 0x437   : > { %v3239_v30 = vrot.slane %v3509_v31, %v4050_v43  ;;  %v3215_v41 = vrot.slane %v3201_v11, %v4050_v43  ;;  %v3248_v9 = vcombine.low %v3085_v16, %v3094_v39  ;;  %v3121_v32 = vrot.slane %v5028_v24, %v4959_v4 }
 0x438   : > { %v3249_v48 = vcombine.low %v3103_v8, %v3112_v2  ;;  %v3040_v28 = vrot.slane %v3033_v56, %v4959_v4  ;;  %v3184_v5 = vrot.slane %v3506_v0, %v4050_v43  ;;  %v3123_v51 = vcombine.low %v5017_v62, %v2921_v45 }
 0x439   : > { %v3240_v42 = vcombine.low %v3232_v13, %v3239_v30  ;;  %v3216_v33 = vcombine.low %v3208_v53, %v3215_v41  ;;  %v3256_v49 = vrot.slane %v3248_v9, %v4050_v43  ;;  %v3139_v23 = vrot.slane %v5100_v37, %v4959_v4 }
 0x43a   : > { %v3263_v24 = vrot.slane %v3249_v48, %v4050_v43  ;;  %v3507_v22 = vcombine.high %v3031_v61, %v3040_v28  ;;  %v3130_v58 = vrot.slane %v3123_v51, %v4959_v4  ;;  %v3141_v17 = vcombine.low %v2960_v26, %v2973_v59 }
 0x43b   : > { %3241 = vrot.lane.b32.xlu0 %v3240_v42, %s3916_s25  ;;  %3217 = vrot.lane.b32.xlu1 %v3216_v33, %s3914_s11  ;;  %v3510_v7 = vcombine.high %v3085_v16, %v3094_v39  ;;  %v3511_v40 = vcombine.high %v3103_v8, %v3112_v2  ;;  %v3154_v62 = vcombine.low %v3013_v55, %v3022_v38  ;;  %s3918_s11 = smov 48   ;;  %s3846_s25 = scalar_lea.vmem %s3845_s23, 256 }
 0x43c   : > { %v3264_v57 = vcombine.low %v3256_v49, %v3263_v24  ;;  %v3191_v45 = vrot.slane %v3507_v22, %v4050_v43  ;;  %v3148_v25 = vrot.slane %v3141_v17, %v4959_v4  ;;  %v3296_v6 = vcombine.low %v3121_v32, %v3130_v58  ;;  %p3848_p1 = scmp.lt.s32.totalorder %s3846_s25, %s3840_s22 }
 0x43d   : > { %v3280_v37 = vrot.slane %v3510_v7, %v4050_v43  ;;  %v3287_v12 = vrot.slane %v3511_v40, %v4050_v43  ;;  %v3512_v35 = vcombine.high %v3121_v32, %v3130_v58  ;;  %v3155_v21 = vcombine.low %v3031_v61, %v3040_v28 }
 0x43e   : > { %v3192_v14 = vcombine.low %v3184_v5, %v3191_v45  ;;  %v3297_v59 = vcombine.low %v3139_v23, %v3148_v25  ;;  %v3513_v29 = vcombine.high %v3139_v23, %v3148_v25  ;;  %v3304_v44 = vrot.slane %v3296_v6, %v4050_v43  ;;  %p3849_p2 = por %p3848_p1, %p3847_p0 }
 0x43f   : > { %3265 = vrot.lane.b32.xlu1 %v3264_v57, %s3917_s26  ;;  %v3288_v50 = vcombine.low %v3280_v37, %v3287_v12  ;;  %v3328_v4 = vrot.slane %v3512_v35, %v4050_v43  ;;  %v3162_v18 = vrot.slane %v3154_v62, %v4050_v43  ;;  %v3169_v63 = vrot.slane %v3155_v21, %v4050_v43 }
 0x440   : > { %3193 = vrot.lane.b32.xlu0 %v3192_v14, %s3909_s16  ;;  %v3311_v1 = vrot.slane %v3297_v59, %v4050_v43  ;;  %v3335_v19 = vrot.slane %v3513_v29, %v4050_v43  ;;  %s3920_s16 = smov 56   ;;  %p3850_p3 = pnand %p3849_p2, %p3843_p13 }
 0x441   : > { %v3170_v3 = vcombine.low %v3162_v18, %v3169_v63 }
 0x442   : > { %v3312_v36 = vcombine.low %v3304_v44, %v3311_v1  ;;  %v3336_v10 = vcombine.low %v3328_v4, %v3335_v19 }
 0x444   : > { %3313 = vrot.lane.b32.xlu1 %v3312_v36, %s3918_s11  ;;  %3289 = vrot.lane.b32.xlu0 %v3288_v50, %s3919_s30 }
 0x448   : > { %3337 = vrot.lane.b32.xlu0 %v3336_v10, %s3920_s16 }
 0x4ad   : > { %v3242_v46 = vpop.permute.xlu0 %3241  ;;  %v3218_v13 = vpop.permute.xlu1 %3217 }
 0x4b1   : > { %v3266_v53 = vpop.permute.xlu1 %3265 }
 0x4b2   : > { %v3194_v34 = vpop.permute.xlu0 %3193 }
 0x4b3   : > { %v3340_v52 = vsel %vm960_vm6, %v3170_v3, %v3194_v34 }
 0x4b4   : > { %v3341_v43 = vsel %vm2142_vm0, %v3340_v52, %v3218_v13 }
 0x4b5   : > { %v3342_v54 = vsel %vm2194_vm1, %v3341_v43, %v3242_v46 }
 0x4b6   : > { %v3290_v16 = vpop.permute.xlu0 %3289  ;;  %v3344_v60 = vsel %vm3343_vm9, %v3342_v54, %v3266_v53  ;;  %v3314_v15 = vpop.permute.xlu1 %3313 }
 0x4b7   : > { %v3346_v47 = vsel %vm3345_vm11, %v3344_v60, %v3290_v16 }
 0x4b8   : > { %v3348_v26 = vsel %vm3347_vm13, %v3346_v47, %v3314_v15 }
 0x4ba   : > { %v3338_v20 = vpop.permute.xlu0 %3337 }
 0x4bb   : > { %v3350_v27 = vsel %vm3349_vm12, %v3348_v26, %v3338_v20 }
 0x4bc   : > { %3352 = vst.msk [vmem:[%s217_s9] sm:$0xff] %vm3351_vm14, %v3350_v27 }
 0x4bd   : > { %3853 = shalt.err (!%p3850_p3)
}
 0x4be   : > { %s3854_s26 = scalar_lea.hbm %s5197_s14, 128  ;;  %s3858_s16 = scalar_lea.hbm %s5244_s5, 256 }
 0x4bf   : > { %p3855_p4 = scmp.ne.s32.totalorder %s5197_s14, %s3854_s26  ;;  %p3859_p9 = scmp.lt.u32.totalorder %s5197_s14, %s5244_s5 }
 0x4c0   : > { %p3860_p10 = scmp.lt.u32.totalorder %s3858_s16, %s3854_s26  ;;  %p3862_p12 = scmp.lt.u32.totalorder %s3854_s26, %s5197_s14 }
 0x4c1   : > { %p3856_p7 = pnand %p3855_p4, %p3990_p5 }
 0x4c2   : > { %p3861_p11 = por %p3860_p10, %p3859_p9 }
 0x4c3   : > { %p3857_p8 = pneg %p3856_p7 }
 0x4c4   : > { %p3863_p13 = por %p3862_p12, %p3861_p11 }
 0x4c6   : > { %p3864_p0 = pnand %p3863_p13, %p3857_p8 }
 0x4c8   : > { %3867 = shalt.err (!%p3864_p0)
}
 0x4c9   : > { %3784 = dma.vmem_to_hbm [thread:$0]  (%p3990_p5), %s5199_s10, 128, %s5197_s14, %s3354_s15  }
 0x4ca PF: > { %p3790_p1 = scmp.ge.s32.totalorder %s3902_s21, 2  ;;  %s3379_s8 = sand.u32 1, %s3890_s18  }
 0x4cb   : > { %s3380_s9 = scalar_lea.sflag [#allocation3], %s3379_s8 }
 0x4cc   : > { %p3787_p2 = pnand %p3790_p1, %p3994_p6 }
 0x4ce   : > { %3885 = dma.done.wait (!%p3787_p2), %s3380_s9, 128  }
 0x4cf   : > { %3887 = vsyncadd (!%p3787_p2), %s3380_s9, 4294967168  ;;  %p15_p3 = scmp.ge.s32.totalorder %s3977_s24, 4   ;;  %s5263_s18 = smov %s3894_s19 }
 0x4d0   : > { %s5264_s19 = smov %s3898_s20  ;;  %s5265_s20 = smov %s3988_s27 }
 0x4d1   : > { %s5266_s21 = smov %s3977_s24  ;;  %17 = sbr.rel (!%p15_p3) target bundleno = 3 (0x3), region = 75 }
 0x4d8   :  { %3385 = vsyncpa [#allocation3], 1 }
 0x4d9   :  { %3387 = vsyncpa [#allocation3 + $0x1], 1 }

</bundles_post_ra>
